<compile_context>
chip_gen: v7x
topology: tpu7x:2x2x1
jax: 0.10.0
libtpu: 0.0.40
codegen_flags: <defaults>
</compile_context>

<pallas_src>
from functools import partial

import jax
import jax.numpy as jnp
from jax.experimental import pallas as pl
from jax.experimental.pallas import tpu as pltpu

N_CH = 16        # conv1 output channels
FC1_OUT = 32     # fc1 output features
OUT_LANES = 128  # lane-dense output block width


def _round_up(a, b):
    return (a + b - 1) // b * b


def cnn_model_kernel(x_ref, cw_ref, cb_ref, w1_ref, b1_ref, w2_ref, b2_ref,
                     out_ref):
    # x_ref  : (TB, HWp)  f32 activation tile (raw input, no channel tiling)
    # cw_ref : (16, 1, HWp) f32 per-channel conv scale, broadcast along lanes
    # cb_ref : (16, 1, HWp) f32 per-channel conv bias
    # w1_ref : (16, HWp, 32) fc1 weight regrouped per conv channel (bf16 or f32)
    # b1_ref : (1, 32) f32 ; w2_ref : (1, 32) f32 ; b2_ref : (1, 1) f32
    # out_ref: (TB, 128) f32 (lane-dense; only column 0 is meaningful)
    x = x_ref[...]                                        # (TB, HWp)
    tb = x.shape[0]

    acc = jnp.zeros((tb, FC1_OUT), jnp.float32)
    # Static unroll over the 16 conv channels: conv(1x1)+ReLU on the VPU,
    # per-channel K-block of fc1 on the MXU with f32 accumulation.
    for c in range(N_CH):
        h = jnp.maximum(x * cw_ref[c] + cb_ref[c], 0.0)   # (TB, HWp) f32
        acc = acc + jnp.dot(h.astype(w1_ref.dtype), w1_ref[c],
                            preferred_element_type=jnp.float32)

    y1 = jnp.maximum(acc + b1_ref[...], 0.0)              # (TB, 32) fc1 + ReLU

    # fc2: K=32, N=1 -> multiply + lane reduce on VPU/XLU, keep the MXU for fc1.
    y2 = jnp.sum(y1 * w2_ref[...], axis=-1, keepdims=True) + b2_ref[...]  # (TB, 1)

    # Lane-dense store (unmasked vst); wrapper slices column 0.
    out_ref[...] = jnp.broadcast_to(y2, out_ref.shape)


@partial(jax.jit, static_argnames=("use_bf16",))
def cnn_model_forward(x, params, *, use_bf16=True):
    """x: (B, 1, H, W) float32 (NCHW, like the PyTorch module). Returns (B, 1)."""
    conv_w = params["conv_w"].reshape(N_CH)               # (16,)
    conv_b = params["conv_b"].reshape(N_CH)               # (16,)
    fc1_w, fc1_b = params["fc1_w"], params["fc1_b"]       # (32, 16*H*W), (32,)
    fc2_w, fc2_b = params["fc2_w"], params["fc2_b"]       # (1, 32), (1,)

    B, C, H, W = x.shape
    assert C == 1
    HW = H * W
    HW_pad = _round_up(HW, 128)                           # lane-align the K blocks

    # Batch tile: power of two, >= 8 sublanes, <= 256 rows, double-buffered
    # activation tiles kept under ~8 MiB so it fits every generation's VMEM.
    b_pad8 = _round_up(B, 8)
    TB = 8
    while TB * 2 <= min(256, b_pad8) and 2 * (TB * 2) * HW_pad * 4 <= (8 << 20):
        TB *= 2
    B_pad = _round_up(B, TB)
    grid = (B_pad // TB,)

    # ---- layout plumbing only (no 16x activation tiling) --------------------
    x_flat = x.reshape(B, HW)
    x_pad = jnp.pad(x_flat, ((0, B_pad - B), (0, HW_pad - HW)))       # (B_pad, HWp)

    # Per-channel conv scale/bias as tiny broadcast rows (16, 1, HWp).
    cw = jnp.broadcast_to(conv_w.reshape(N_CH, 1, 1), (N_CH, 1, HW_pad))
    cb = jnp.broadcast_to(conv_b.reshape(N_CH, 1, 1), (N_CH, 1, HW_pad))

    # fc1 weight regrouped per conv channel; pad K (spatial) with zeros so the
    # padded activation positions contribute nothing.
    w1 = fc1_w.T.reshape(N_CH, HW, FC1_OUT)                           # (16, HW, 32)
    w1 = jnp.pad(w1, ((0, 0), (0, HW_pad - HW), (0, 0)))              # (16, HWp, 32)
    if use_bf16:
        w1 = w1.astype(jnp.bfloat16)   # MXU runs bf16 natively; accumulation is f32.
    b1 = fc1_b.reshape(1, FC1_OUT)
    w2 = fc2_w.reshape(1, FC1_OUT)
    b2 = fc2_b.reshape(1, 1)

    # VMEM budget: double-buffered x/out tiles + resident weights (+ slack).
    vmem_need = (2 * TB * HW_pad * 4 + 2 * TB * OUT_LANES * 4
                 + 2 * N_CH * HW_pad * FC1_OUT * w1.dtype.itemsize
                 + 2 * N_CH * HW_pad * 4 * 2
                 + (1 << 20))
    vmem_limit = int(min(max(2 * vmem_need, 32 << 20), 64 << 20))

    out = pl.pallas_call(
        cnn_model_kernel,
        out_shape=jax.ShapeDtypeStruct((B_pad, OUT_LANES), jnp.float32),
        grid=grid,
        in_specs=[
            pl.BlockSpec((TB, HW_pad), lambda i: (i, 0)),                 # x tile
            pl.BlockSpec((N_CH, 1, HW_pad), lambda i: (0, 0, 0)),         # conv scale
            pl.BlockSpec((N_CH, 1, HW_pad), lambda i: (0, 0, 0)),         # conv bias
            pl.BlockSpec((N_CH, HW_pad, FC1_OUT), lambda i: (0, 0, 0)),   # fc1 W (resident)
            pl.BlockSpec((1, FC1_OUT), lambda i: (0, 0)),                 # fc1 bias
            pl.BlockSpec((1, FC1_OUT), lambda i: (0, 0)),                 # fc2 weight row
            pl.BlockSpec((1, 1), lambda i: (0, 0)),                       # fc2 bias
        ],
        out_specs=pl.BlockSpec((TB, OUT_LANES), lambda i: (i, 0)),
        compiler_params=pltpu.CompilerParams(
            dimension_semantics=("parallel",),
            vmem_limit_bytes=vmem_limit,
        ),
    )(x_pad, cw, cb, w1, b1, w2, b2)

    return out[:B, :1]


def init_params(height, width, key):
    """Deterministic synthetic parameters matching the PyTorch module shapes."""
    F = 16 * height * width
    k = jax.random.split(key, 6)
    return {
        # nn.Conv2d(1, 16, kernel_size=1): weight (16,1,1,1), bias (16,)
        "conv_w": jax.random.normal(k[0], (16, 1, 1, 1), jnp.float32) * 0.1,
        "conv_b": jax.random.normal(k[1], (16,), jnp.float32) * 0.1,
        # nn.Linear(16*H*W, 32): weight (32, 16*H*W), bias (32,)
        "fc1_w": jax.random.normal(k[2], (32, F), jnp.float32) * 0.02,
        "fc1_b": jax.random.normal(k[3], (32,), jnp.float32) * 0.1,
        # nn.Linear(32, 1): weight (1, 32), bias (1,)
        "fc2_w": jax.random.normal(k[4], (1, 32), jnp.float32) * 0.1,
        "fc2_b": jax.random.normal(k[5], (1,), jnp.float32) * 0.1,
    }


def reference_forward(x, p):
    """Pure-JAX f32 reference mirroring the PyTorch forward exactly."""
    B = x.shape[0]
    conv = x * p["conv_w"].reshape(1, 16, 1, 1)      # 1x1 conv, in_channels == 1
    conv = conv + p["conv_b"].reshape(1, 16, 1, 1)
    h = jnp.maximum(conv, 0.0).reshape(B, -1)        # flatten c, h, w
    y1 = jnp.maximum(h @ p["fc1_w"].T + p["fc1_b"], 0.0)
    return y1 @ p["fc2_w"].T + p["fc2_b"]


if __name__ == "__main__":
    height, width, batch = 8, 8, 2
    key = jax.random.PRNGKey(0)
    kx, kp = jax.random.split(key)
    x = jax.random.normal(kx, (batch, 1, height, width), jnp.float32)
    params = init_params(height, width, kp)

    ref = reference_forward(x, params)

    # Full-f32 path: matches the reference to matmul-ordering precision.
    out_f32 = jax.block_until_ready(cnn_model_forward(x, params, use_bf16=False))
    assert out_f32.shape == (batch, 1)
    assert jnp.allclose(out_f32, ref, atol=1e-4, rtol=1e-4), (out_f32, ref)

    # Default bf16-MXU path (f32 accumulation): looser tolerance for bf16 inputs.
    out_bf16 = jax.block_until_ready(cnn_model_forward(x, params))
    assert out_bf16.shape == (batch, 1)
    assert jnp.allclose(out_bf16, ref, atol=1e-2, rtol=1e-2), (out_bf16, ref)

    print("KERNEL_OK")
</pallas_src>

<mosaic_0001>
module attributes {stable_mosaic.version = 11 : i64} {
  func.func @cnn_model_kernel(%arg0: i32, %arg1: memref<8x128xf32, #tpu.memory_space<vmem>>, %arg2: memref<16x1x128xf32, #tpu.memory_space<vmem>>, %arg3: memref<16x1x128xf32, #tpu.memory_space<vmem>>, %arg4: memref<16x128x32xf32, #tpu.memory_space<vmem>>, %arg5: memref<1x32xf32, #tpu.memory_space<vmem>>, %arg6: memref<1x32xf32, #tpu.memory_space<vmem>>, %arg7: memref<1x1xf32, #tpu.memory_space<vmem>>, %arg8: memref<8x128xf32, #tpu.memory_space<vmem>>) attributes {dimension_semantics = [#tpu.dimension_semantics<parallel>], iteration_bounds = array<i64: 1>, scalar_prefetch = 0 : i64, scratch_operands = 0 : i64, tpu.core_type = #tpu.core_type<tc>, window_params = [{transform_indices = @transform_0, window_bounds = array<i64: 8, 128>}, {pipeline_mode = #tpu.pipeline_mode<synchronous>, transform_indices = @transform_1, window_bounds = array<i64: 16, 1, 128>}, {pipeline_mode = #tpu.pipeline_mode<synchronous>, transform_indices = @transform_2, window_bounds = array<i64: 16, 1, 128>}, {pipeline_mode = #tpu.pipeline_mode<synchronous>, transform_indices = @transform_3, window_bounds = array<i64: 16, 128, 32>}, {pipeline_mode = #tpu.pipeline_mode<synchronous>, transform_indices = @transform_4, window_bounds = array<i64: 1, 32>}, {pipeline_mode = #tpu.pipeline_mode<synchronous>, transform_indices = @transform_5, window_bounds = array<i64: 1, 32>}, {pipeline_mode = #tpu.pipeline_mode<synchronous>, transform_indices = @transform_6, window_bounds = array<i64: 1, 1>}, {transform_indices = @transform_7, window_bounds = array<i64: 8, 128>}]} {
    %c0 = arith.constant 0 : index
    %c0_0 = arith.constant 0 : index
    %0 = vector.load %arg1[%c0, %c0_0] : memref<8x128xf32, #tpu.memory_space<vmem>>, vector<8x128xf32>
    %cst = arith.constant 0.000000e+00 : f32
    %1 = vector.broadcast %cst : f32 to vector<8x32xf32>
    %c0_1 = arith.constant 0 : index
    %c0_2 = arith.constant 0 : index
    %c0_3 = arith.constant 0 : index
    %2 = vector.load %arg2[%c0_1, %c0_2, %c0_3] : memref<16x1x128xf32, #tpu.memory_space<vmem>>, vector<1x1x128xf32>
    %3 = vector.shape_cast %2 : vector<1x1x128xf32> to vector<1x128xf32>
    %4 = vector.broadcast %3 : vector<1x128xf32> to vector<8x128xf32>
    %5 = arith.mulf %0, %4 : vector<8x128xf32>
    %c0_4 = arith.constant 0 : index
    %c0_5 = arith.constant 0 : index
    %c0_6 = arith.constant 0 : index
    %6 = vector.load %arg3[%c0_4, %c0_5, %c0_6] : memref<16x1x128xf32, #tpu.memory_space<vmem>>, vector<1x1x128xf32>
    %7 = vector.shape_cast %6 : vector<1x1x128xf32> to vector<1x128xf32>
    %8 = vector.broadcast %7 : vector<1x128xf32> to vector<8x128xf32>
    %9 = arith.addf %5, %8 : vector<8x128xf32>
    %cst_7 = arith.constant 0.000000e+00 : f32
    %10 = vector.broadcast %cst_7 : f32 to vector<8x128xf32>
    %11 = arith.maximumf %9, %10 : vector<8x128xf32>
    %c0_8 = arith.constant 0 : index
    %c0_9 = arith.constant 0 : index
    %c0_10 = arith.constant 0 : index
    %12 = vector.load %arg4[%c0_8, %c0_9, %c0_10] : memref<16x128x32xf32, #tpu.memory_space<vmem>>, vector<1x128x32xf32>
    %13 = vector.shape_cast %12 : vector<1x128x32xf32> to vector<128x32xf32>
    %cst_11 = arith.constant dense<0.000000e+00> : vector<8x32xf32>
    %14 = tpu.matmul %11, %13, %cst_11 {dimension_numbers = #tpu.dot_dimension_numbers<[1], [0], [0], [1], [0, 0, 1, 1], [], []>} : vector<8x128xf32>, vector<128x32xf32>, vector<8x32xf32> -> vector<8x32xf32>
    %15 = arith.addf %1, %14 : vector<8x32xf32>
    %c1 = arith.constant 1 : index
    %c0_12 = arith.constant 0 : index
    %c0_13 = arith.constant 0 : index
    %16 = vector.load %arg2[%c1, %c0_12, %c0_13] : memref<16x1x128xf32, #tpu.memory_space<vmem>>, vector<1x1x128xf32>
    %17 = vector.shape_cast %16 : vector<1x1x128xf32> to vector<1x128xf32>
    %18 = vector.broadcast %17 : vector<1x128xf32> to vector<8x128xf32>
    %19 = arith.mulf %0, %18 : vector<8x128xf32>
    %c1_14 = arith.constant 1 : index
    %c0_15 = arith.constant 0 : index
    %c0_16 = arith.constant 0 : index
    %20 = vector.load %arg3[%c1_14, %c0_15, %c0_16] : memref<16x1x128xf32, #tpu.memory_space<vmem>>, vector<1x1x128xf32>
    %21 = vector.shape_cast %20 : vector<1x1x128xf32> to vector<1x128xf32>
    %22 = vector.broadcast %21 : vector<1x128xf32> to vector<8x128xf32>
    %23 = arith.addf %19, %22 : vector<8x128xf32>
    %cst_17 = arith.constant 0.000000e+00 : f32
    %24 = vector.broadcast %cst_17 : f32 to vector<8x128xf32>
    %25 = arith.maximumf %23, %24 : vector<8x128xf32>
    %c1_18 = arith.constant 1 : index
    %c0_19 = arith.constant 0 : index
    %c0_20 = arith.constant 0 : index
    %26 = vector.load %arg4[%c1_18, %c0_19, %c0_20] : memref<16x128x32xf32, #tpu.memory_space<vmem>>, vector<1x128x32xf32>
    %27 = vector.shape_cast %26 : vector<1x128x32xf32> to vector<128x32xf32>
    %cst_21 = arith.constant dense<0.000000e+00> : vector<8x32xf32>
    %28 = tpu.matmul %25, %27, %cst_21 {dimension_numbers = #tpu.dot_dimension_numbers<[1], [0], [0], [1], [0, 0, 1, 1], [], []>} : vector<8x128xf32>, vector<128x32xf32>, vector<8x32xf32> -> vector<8x32xf32>
    %29 = arith.addf %15, %28 : vector<8x32xf32>
    %c2 = arith.constant 2 : index
    %c0_22 = arith.constant 0 : index
    %c0_23 = arith.constant 0 : index
    %30 = vector.load %arg2[%c2, %c0_22, %c0_23] : memref<16x1x128xf32, #tpu.memory_space<vmem>>, vector<1x1x128xf32>
    %31 = vector.shape_cast %30 : vector<1x1x128xf32> to vector<1x128xf32>
    %32 = vector.broadcast %31 : vector<1x128xf32> to vector<8x128xf32>
    %33 = arith.mulf %0, %32 : vector<8x128xf32>
    %c2_24 = arith.constant 2 : index
    %c0_25 = arith.constant 0 : index
    %c0_26 = arith.constant 0 : index
    %34 = vector.load %arg3[%c2_24, %c0_25, %c0_26] : memref<16x1x128xf32, #tpu.memory_space<vmem>>, vector<1x1x128xf32>
    %35 = vector.shape_cast %34 : vector<1x1x128xf32> to vector<1x128xf32>
    %36 = vector.broadcast %35 : vector<1x128xf32> to vector<8x128xf32>
    %37 = arith.addf %33, %36 : vector<8x128xf32>
    %cst_27 = arith.constant 0.000000e+00 : f32
    %38 = vector.broadcast %cst_27 : f32 to vector<8x128xf32>
    %39 = arith.maximumf %37, %38 : vector<8x128xf32>
    %c2_28 = arith.constant 2 : index
    %c0_29 = arith.constant 0 : index
    %c0_30 = arith.constant 0 : index
    %40 = vector.load %arg4[%c2_28, %c0_29, %c0_30] : memref<16x128x32xf32, #tpu.memory_space<vmem>>, vector<1x128x32xf32>
    %41 = vector.shape_cast %40 : vector<1x128x32xf32> to vector<128x32xf32>
    %cst_31 = arith.constant dense<0.000000e+00> : vector<8x32xf32>
    %42 = tpu.matmul %39, %41, %cst_31 {dimension_numbers = #tpu.dot_dimension_numbers<[1], [0], [0], [1], [0, 0, 1, 1], [], []>} : vector<8x128xf32>, vector<128x32xf32>, vector<8x32xf32> -> vector<8x32xf32>
    %43 = arith.addf %29, %42 : vector<8x32xf32>
    %c3 = arith.constant 3 : index
    %c0_32 = arith.constant 0 : index
    %c0_33 = arith.constant 0 : index
    %44 = vector.load %arg2[%c3, %c0_32, %c0_33] : memref<16x1x128xf32, #tpu.memory_space<vmem>>, vector<1x1x128xf32>
    %45 = vector.shape_cast %44 : vector<1x1x128xf32> to vector<1x128xf32>
    %46 = vector.broadcast %45 : vector<1x128xf32> to vector<8x128xf32>
    %47 = arith.mulf %0, %46 : vector<8x128xf32>
    %c3_34 = arith.constant 3 : index
    %c0_35 = arith.constant 0 : index
    %c0_36 = arith.constant 0 : index
    %48 = vector.load %arg3[%c3_34, %c0_35, %c0_36] : memref<16x1x128xf32, #tpu.memory_space<vmem>>, vector<1x1x128xf32>
    %49 = vector.shape_cast %48 : vector<1x1x128xf32> to vector<1x128xf32>
    %50 = vector.broadcast %49 : vector<1x128xf32> to vector<8x128xf32>
    %51 = arith.addf %47, %50 : vector<8x128xf32>
    %cst_37 = arith.constant 0.000000e+00 : f32
    %52 = vector.broadcast %cst_37 : f32 to vector<8x128xf32>
    %53 = arith.maximumf %51, %52 : vector<8x128xf32>
    %c3_38 = arith.constant 3 : index
    %c0_39 = arith.constant 0 : index
    %c0_40 = arith.constant 0 : index
    %54 = vector.load %arg4[%c3_38, %c0_39, %c0_40] : memref<16x128x32xf32, #tpu.memory_space<vmem>>, vector<1x128x32xf32>
    %55 = vector.shape_cast %54 : vector<1x128x32xf32> to vector<128x32xf32>
    %cst_41 = arith.constant dense<0.000000e+00> : vector<8x32xf32>
    %56 = tpu.matmul %53, %55, %cst_41 {dimension_numbers = #tpu.dot_dimension_numbers<[1], [0], [0], [1], [0, 0, 1, 1], [], []>} : vector<8x128xf32>, vector<128x32xf32>, vector<8x32xf32> -> vector<8x32xf32>
    %57 = arith.addf %43, %56 : vector<8x32xf32>
    %c4 = arith.constant 4 : index
    %c0_42 = arith.constant 0 : index
    %c0_43 = arith.constant 0 : index
    %58 = vector.load %arg2[%c4, %c0_42, %c0_43] : memref<16x1x128xf32, #tpu.memory_space<vmem>>, vector<1x1x128xf32>
    %59 = vector.shape_cast %58 : vector<1x1x128xf32> to vector<1x128xf32>
    %60 = vector.broadcast %59 : vector<1x128xf32> to vector<8x128xf32>
    %61 = arith.mulf %0, %60 : vector<8x128xf32>
    %c4_44 = arith.constant 4 : index
    %c0_45 = arith.constant 0 : index
    %c0_46 = arith.constant 0 : index
    %62 = vector.load %arg3[%c4_44, %c0_45, %c0_46] : memref<16x1x128xf32, #tpu.memory_space<vmem>>, vector<1x1x128xf32>
    %63 = vector.shape_cast %62 : vector<1x1x128xf32> to vector<1x128xf32>
    %64 = vector.broadcast %63 : vector<1x128xf32> to vector<8x128xf32>
    %65 = arith.addf %61, %64 : vector<8x128xf32>
    %cst_47 = arith.constant 0.000000e+00 : f32
    %66 = vector.broadcast %cst_47 : f32 to vector<8x128xf32>
    %67 = arith.maximumf %65, %66 : vector<8x128xf32>
    %c4_48 = arith.constant 4 : index
    %c0_49 = arith.constant 0 : index
    %c0_50 = arith.constant 0 : index
    %68 = vector.load %arg4[%c4_48, %c0_49, %c0_50] : memref<16x128x32xf32, #tpu.memory_space<vmem>>, vector<1x128x32xf32>
    %69 = vector.shape_cast %68 : vector<1x128x32xf32> to vector<128x32xf32>
    %cst_51 = arith.constant dense<0.000000e+00> : vector<8x32xf32>
    %70 = tpu.matmul %67, %69, %cst_51 {dimension_numbers = #tpu.dot_dimension_numbers<[1], [0], [0], [1], [0, 0, 1, 1], [], []>} : vector<8x128xf32>, vector<128x32xf32>, vector<8x32xf32> -> vector<8x32xf32>
    %71 = arith.addf %57, %70 : vector<8x32xf32>
    %c5 = arith.constant 5 : index
    %c0_52 = arith.constant 0 : index
    %c0_53 = arith.constant 0 : index
    %72 = vector.load %arg2[%c5, %c0_52, %c0_53] : memref<16x1x128xf32, #tpu.memory_space<vmem>>, vector<1x1x128xf32>
    %73 = vector.shape_cast %72 : vector<1x1x128xf32> to vector<1x128xf32>
    %74 = vector.broadcast %73 : vector<1x128xf32> to vector<8x128xf32>
    %75 = arith.mulf %0, %74 : vector<8x128xf32>
    %c5_54 = arith.constant 5 : index
    %c0_55 = arith.constant 0 : index
    %c0_56 = arith.constant 0 : index
    %76 = vector.load %arg3[%c5_54, %c0_55, %c0_56] : memref<16x1x128xf32, #tpu.memory_space<vmem>>, vector<1x1x128xf32>
    %77 = vector.shape_cast %76 : vector<1x1x128xf32> to vector<1x128xf32>
    %78 = vector.broadcast %77 : vector<1x128xf32> to vector<8x128xf32>
    %79 = arith.addf %75, %78 : vector<8x128xf32>
    %cst_57 = arith.constant 0.000000e+00 : f32
    %80 = vector.broadcast %cst_57 : f32 to vector<8x128xf32>
    %81 = arith.maximumf %79, %80 : vector<8x128xf32>
    %c5_58 = arith.constant 5 : index
    %c0_59 = arith.constant 0 : index
    %c0_60 = arith.constant 0 : index
    %82 = vector.load %arg4[%c5_58, %c0_59, %c0_60] : memref<16x128x32xf32, #tpu.memory_space<vmem>>, vector<1x128x32xf32>
    %83 = vector.shape_cast %82 : vector<1x128x32xf32> to vector<128x32xf32>
    %cst_61 = arith.constant dense<0.000000e+00> : vector<8x32xf32>
    %84 = tpu.matmul %81, %83, %cst_61 {dimension_numbers = #tpu.dot_dimension_numbers<[1], [0], [0], [1], [0, 0, 1, 1], [], []>} : vector<8x128xf32>, vector<128x32xf32>, vector<8x32xf32> -> vector<8x32xf32>
    %85 = arith.addf %71, %84 : vector<8x32xf32>
    %c6 = arith.constant 6 : index
    %c0_62 = arith.constant 0 : index
    %c0_63 = arith.constant 0 : index
    %86 = vector.load %arg2[%c6, %c0_62, %c0_63] : memref<16x1x128xf32, #tpu.memory_space<vmem>>, vector<1x1x128xf32>
    %87 = vector.shape_cast %86 : vector<1x1x128xf32> to vector<1x128xf32>
    %88 = vector.broadcast %87 : vector<1x128xf32> to vector<8x128xf32>
    %89 = arith.mulf %0, %88 : vector<8x128xf32>
    %c6_64 = arith.constant 6 : index
    %c0_65 = arith.constant 0 : index
    %c0_66 = arith.constant 0 : index
    %90 = vector.load %arg3[%c6_64, %c0_65, %c0_66] : memref<16x1x128xf32, #tpu.memory_space<vmem>>, vector<1x1x128xf32>
    %91 = vector.shape_cast %90 : vector<1x1x128xf32> to vector<1x128xf32>
    %92 = vector.broadcast %91 : vector<1x128xf32> to vector<8x128xf32>
    %93 = arith.addf %89, %92 : vector<8x128xf32>
    %cst_67 = arith.constant 0.000000e+00 : f32
    %94 = vector.broadcast %cst_67 : f32 to vector<8x128xf32>
    %95 = arith.maximumf %93, %94 : vector<8x128xf32>
    %c6_68 = arith.constant 6 : index
    %c0_69 = arith.constant 0 : index
    %c0_70 = arith.constant 0 : index
    %96 = vector.load %arg4[%c6_68, %c0_69, %c0_70] : memref<16x128x32xf32, #tpu.memory_space<vmem>>, vector<1x128x32xf32>
    %97 = vector.shape_cast %96 : vector<1x128x32xf32> to vector<128x32xf32>
    %cst_71 = arith.constant dense<0.000000e+00> : vector<8x32xf32>
    %98 = tpu.matmul %95, %97, %cst_71 {dimension_numbers = #tpu.dot_dimension_numbers<[1], [0], [0], [1], [0, 0, 1, 1], [], []>} : vector<8x128xf32>, vector<128x32xf32>, vector<8x32xf32> -> vector<8x32xf32>
    %99 = arith.addf %85, %98 : vector<8x32xf32>
    %c7 = arith.constant 7 : index
    %c0_72 = arith.constant 0 : index
    %c0_73 = arith.constant 0 : index
    %100 = vector.load %arg2[%c7, %c0_72, %c0_73] : memref<16x1x128xf32, #tpu.memory_space<vmem>>, vector<1x1x128xf32>
    %101 = vector.shape_cast %100 : vector<1x1x128xf32> to vector<1x128xf32>
    %102 = vector.broadcast %101 : vector<1x128xf32> to vector<8x128xf32>
    %103 = arith.mulf %0, %102 : vector<8x128xf32>
    %c7_74 = arith.constant 7 : index
    %c0_75 = arith.constant 0 : index
    %c0_76 = arith.constant 0 : index
    %104 = vector.load %arg3[%c7_74, %c0_75, %c0_76] : memref<16x1x128xf32, #tpu.memory_space<vmem>>, vector<1x1x128xf32>
    %105 = vector.shape_cast %104 : vector<1x1x128xf32> to vector<1x128xf32>
    %106 = vector.broadcast %105 : vector<1x128xf32> to vector<8x128xf32>
    %107 = arith.addf %103, %106 : vector<8x128xf32>
    %cst_77 = arith.constant 0.000000e+00 : f32
    %108 = vector.broadcast %cst_77 : f32 to vector<8x128xf32>
    %109 = arith.maximumf %107, %108 : vector<8x128xf32>
    %c7_78 = arith.constant 7 : index
    %c0_79 = arith.constant 0 : index
    %c0_80 = arith.constant 0 : index
    %110 = vector.load %arg4[%c7_78, %c0_79, %c0_80] : memref<16x128x32xf32, #tpu.memory_space<vmem>>, vector<1x128x32xf32>
    %111 = vector.shape_cast %110 : vector<1x128x32xf32> to vector<128x32xf32>
    %cst_81 = arith.constant dense<0.000000e+00> : vector<8x32xf32>
    %112 = tpu.matmul %109, %111, %cst_81 {dimension_numbers = #tpu.dot_dimension_numbers<[1], [0], [0], [1], [0, 0, 1, 1], [], []>} : vector<8x128xf32>, vector<128x32xf32>, vector<8x32xf32> -> vector<8x32xf32>
    %113 = arith.addf %99, %112 : vector<8x32xf32>
    %c8 = arith.constant 8 : index
    %c0_82 = arith.constant 0 : index
    %c0_83 = arith.constant 0 : index
    %114 = vector.load %arg2[%c8, %c0_82, %c0_83] : memref<16x1x128xf32, #tpu.memory_space<vmem>>, vector<1x1x128xf32>
    %115 = vector.shape_cast %114 : vector<1x1x128xf32> to vector<1x128xf32>
    %116 = vector.broadcast %115 : vector<1x128xf32> to vector<8x128xf32>
    %117 = arith.mulf %0, %116 : vector<8x128xf32>
    %c8_84 = arith.constant 8 : index
    %c0_85 = arith.constant 0 : index
    %c0_86 = arith.constant 0 : index
    %118 = vector.load %arg3[%c8_84, %c0_85, %c0_86] : memref<16x1x128xf32, #tpu.memory_space<vmem>>, vector<1x1x128xf32>
    %119 = vector.shape_cast %118 : vector<1x1x128xf32> to vector<1x128xf32>
    %120 = vector.broadcast %119 : vector<1x128xf32> to vector<8x128xf32>
    %121 = arith.addf %117, %120 : vector<8x128xf32>
    %cst_87 = arith.constant 0.000000e+00 : f32
    %122 = vector.broadcast %cst_87 : f32 to vector<8x128xf32>
    %123 = arith.maximumf %121, %122 : vector<8x128xf32>
    %c8_88 = arith.constant 8 : index
    %c0_89 = arith.constant 0 : index
    %c0_90 = arith.constant 0 : index
    %124 = vector.load %arg4[%c8_88, %c0_89, %c0_90] : memref<16x128x32xf32, #tpu.memory_space<vmem>>, vector<1x128x32xf32>
    %125 = vector.shape_cast %124 : vector<1x128x32xf32> to vector<128x32xf32>
    %cst_91 = arith.constant dense<0.000000e+00> : vector<8x32xf32>
    %126 = tpu.matmul %123, %125, %cst_91 {dimension_numbers = #tpu.dot_dimension_numbers<[1], [0], [0], [1], [0, 0, 1, 1], [], []>} : vector<8x128xf32>, vector<128x32xf32>, vector<8x32xf32> -> vector<8x32xf32>
    %127 = arith.addf %113, %126 : vector<8x32xf32>
    %c9 = arith.constant 9 : index
    %c0_92 = arith.constant 0 : index
    %c0_93 = arith.constant 0 : index
    %128 = vector.load %arg2[%c9, %c0_92, %c0_93] : memref<16x1x128xf32, #tpu.memory_space<vmem>>, vector<1x1x128xf32>
    %129 = vector.shape_cast %128 : vector<1x1x128xf32> to vector<1x128xf32>
    %130 = vector.broadcast %129 : vector<1x128xf32> to vector<8x128xf32>
    %131 = arith.mulf %0, %130 : vector<8x128xf32>
    %c9_94 = arith.constant 9 : index
    %c0_95 = arith.constant 0 : index
    %c0_96 = arith.constant 0 : index
    %132 = vector.load %arg3[%c9_94, %c0_95, %c0_96] : memref<16x1x128xf32, #tpu.memory_space<vmem>>, vector<1x1x128xf32>
    %133 = vector.shape_cast %132 : vector<1x1x128xf32> to vector<1x128xf32>
    %134 = vector.broadcast %133 : vector<1x128xf32> to vector<8x128xf32>
    %135 = arith.addf %131, %134 : vector<8x128xf32>
    %cst_97 = arith.constant 0.000000e+00 : f32
    %136 = vector.broadcast %cst_97 : f32 to vector<8x128xf32>
    %137 = arith.maximumf %135, %136 : vector<8x128xf32>
    %c9_98 = arith.constant 9 : index
    %c0_99 = arith.constant 0 : index
    %c0_100 = arith.constant 0 : index
    %138 = vector.load %arg4[%c9_98, %c0_99, %c0_100] : memref<16x128x32xf32, #tpu.memory_space<vmem>>, vector<1x128x32xf32>
    %139 = vector.shape_cast %138 : vector<1x128x32xf32> to vector<128x32xf32>
    %cst_101 = arith.constant dense<0.000000e+00> : vector<8x32xf32>
    %140 = tpu.matmul %137, %139, %cst_101 {dimension_numbers = #tpu.dot_dimension_numbers<[1], [0], [0], [1], [0, 0, 1, 1], [], []>} : vector<8x128xf32>, vector<128x32xf32>, vector<8x32xf32> -> vector<8x32xf32>
    %141 = arith.addf %127, %140 : vector<8x32xf32>
    %c10 = arith.constant 10 : index
    %c0_102 = arith.constant 0 : index
    %c0_103 = arith.constant 0 : index
    %142 = vector.load %arg2[%c10, %c0_102, %c0_103] : memref<16x1x128xf32, #tpu.memory_space<vmem>>, vector<1x1x128xf32>
    %143 = vector.shape_cast %142 : vector<1x1x128xf32> to vector<1x128xf32>
    %144 = vector.broadcast %143 : vector<1x128xf32> to vector<8x128xf32>
    %145 = arith.mulf %0, %144 : vector<8x128xf32>
    %c10_104 = arith.constant 10 : index
    %c0_105 = arith.constant 0 : index
    %c0_106 = arith.constant 0 : index
    %146 = vector.load %arg3[%c10_104, %c0_105, %c0_106] : memref<16x1x128xf32, #tpu.memory_space<vmem>>, vector<1x1x128xf32>
    %147 = vector.shape_cast %146 : vector<1x1x128xf32> to vector<1x128xf32>
    %148 = vector.broadcast %147 : vector<1x128xf32> to vector<8x128xf32>
    %149 = arith.addf %145, %148 : vector<8x128xf32>
    %cst_107 = arith.constant 0.000000e+00 : f32
    %150 = vector.broadcast %cst_107 : f32 to vector<8x128xf32>
    %151 = arith.maximumf %149, %150 : vector<8x128xf32>
    %c10_108 = arith.constant 10 : index
    %c0_109 = arith.constant 0 : index
    %c0_110 = arith.constant 0 : index
    %152 = vector.load %arg4[%c10_108, %c0_109, %c0_110] : memref<16x128x32xf32, #tpu.memory_space<vmem>>, vector<1x128x32xf32>
    %153 = vector.shape_cast %152 : vector<1x128x32xf32> to vector<128x32xf32>
    %cst_111 = arith.constant dense<0.000000e+00> : vector<8x32xf32>
    %154 = tpu.matmul %151, %153, %cst_111 {dimension_numbers = #tpu.dot_dimension_numbers<[1], [0], [0], [1], [0, 0, 1, 1], [], []>} : vector<8x128xf32>, vector<128x32xf32>, vector<8x32xf32> -> vector<8x32xf32>
    %155 = arith.addf %141, %154 : vector<8x32xf32>
    %c11 = arith.constant 11 : index
    %c0_112 = arith.constant 0 : index
    %c0_113 = arith.constant 0 : index
    %156 = vector.load %arg2[%c11, %c0_112, %c0_113] : memref<16x1x128xf32, #tpu.memory_space<vmem>>, vector<1x1x128xf32>
    %157 = vector.shape_cast %156 : vector<1x1x128xf32> to vector<1x128xf32>
    %158 = vector.broadcast %157 : vector<1x128xf32> to vector<8x128xf32>
    %159 = arith.mulf %0, %158 : vector<8x128xf32>
    %c11_114 = arith.constant 11 : index
    %c0_115 = arith.constant 0 : index
    %c0_116 = arith.constant 0 : index
    %160 = vector.load %arg3[%c11_114, %c0_115, %c0_116] : memref<16x1x128xf32, #tpu.memory_space<vmem>>, vector<1x1x128xf32>
    %161 = vector.shape_cast %160 : vector<1x1x128xf32> to vector<1x128xf32>
    %162 = vector.broadcast %161 : vector<1x128xf32> to vector<8x128xf32>
    %163 = arith.addf %159, %162 : vector<8x128xf32>
    %cst_117 = arith.constant 0.000000e+00 : f32
    %164 = vector.broadcast %cst_117 : f32 to vector<8x128xf32>
    %165 = arith.maximumf %163, %164 : vector<8x128xf32>
    %c11_118 = arith.constant 11 : index
    %c0_119 = arith.constant 0 : index
    %c0_120 = arith.constant 0 : index
    %166 = vector.load %arg4[%c11_118, %c0_119, %c0_120] : memref<16x128x32xf32, #tpu.memory_space<vmem>>, vector<1x128x32xf32>
    %167 = vector.shape_cast %166 : vector<1x128x32xf32> to vector<128x32xf32>
    %cst_121 = arith.constant dense<0.000000e+00> : vector<8x32xf32>
    %168 = tpu.matmul %165, %167, %cst_121 {dimension_numbers = #tpu.dot_dimension_numbers<[1], [0], [0], [1], [0, 0, 1, 1], [], []>} : vector<8x128xf32>, vector<128x32xf32>, vector<8x32xf32> -> vector<8x32xf32>
    %169 = arith.addf %155, %168 : vector<8x32xf32>
    %c12 = arith.constant 12 : index
    %c0_122 = arith.constant 0 : index
    %c0_123 = arith.constant 0 : index
    %170 = vector.load %arg2[%c12, %c0_122, %c0_123] : memref<16x1x128xf32, #tpu.memory_space<vmem>>, vector<1x1x128xf32>
    %171 = vector.shape_cast %170 : vector<1x1x128xf32> to vector<1x128xf32>
    %172 = vector.broadcast %171 : vector<1x128xf32> to vector<8x128xf32>
    %173 = arith.mulf %0, %172 : vector<8x128xf32>
    %c12_124 = arith.constant 12 : index
    %c0_125 = arith.constant 0 : index
    %c0_126 = arith.constant 0 : index
    %174 = vector.load %arg3[%c12_124, %c0_125, %c0_126] : memref<16x1x128xf32, #tpu.memory_space<vmem>>, vector<1x1x128xf32>
    %175 = vector.shape_cast %174 : vector<1x1x128xf32> to vector<1x128xf32>
    %176 = vector.broadcast %175 : vector<1x128xf32> to vector<8x128xf32>
    %177 = arith.addf %173, %176 : vector<8x128xf32>
    %cst_127 = arith.constant 0.000000e+00 : f32
    %178 = vector.broadcast %cst_127 : f32 to vector<8x128xf32>
    %179 = arith.maximumf %177, %178 : vector<8x128xf32>
    %c12_128 = arith.constant 12 : index
    %c0_129 = arith.constant 0 : index
    %c0_130 = arith.constant 0 : index
    %180 = vector.load %arg4[%c12_128, %c0_129, %c0_130] : memref<16x128x32xf32, #tpu.memory_space<vmem>>, vector<1x128x32xf32>
    %181 = vector.shape_cast %180 : vector<1x128x32xf32> to vector<128x32xf32>
    %cst_131 = arith.constant dense<0.000000e+00> : vector<8x32xf32>
    %182 = tpu.matmul %179, %181, %cst_131 {dimension_numbers = #tpu.dot_dimension_numbers<[1], [0], [0], [1], [0, 0, 1, 1], [], []>} : vector<8x128xf32>, vector<128x32xf32>, vector<8x32xf32> -> vector<8x32xf32>
    %183 = arith.addf %169, %182 : vector<8x32xf32>
    %c13 = arith.constant 13 : index
    %c0_132 = arith.constant 0 : index
    %c0_133 = arith.constant 0 : index
    %184 = vector.load %arg2[%c13, %c0_132, %c0_133] : memref<16x1x128xf32, #tpu.memory_space<vmem>>, vector<1x1x128xf32>
    %185 = vector.shape_cast %184 : vector<1x1x128xf32> to vector<1x128xf32>
    %186 = vector.broadcast %185 : vector<1x128xf32> to vector<8x128xf32>
    %187 = arith.mulf %0, %186 : vector<8x128xf32>
    %c13_134 = arith.constant 13 : index
    %c0_135 = arith.constant 0 : index
    %c0_136 = arith.constant 0 : index
    %188 = vector.load %arg3[%c13_134, %c0_135, %c0_136] : memref<16x1x128xf32, #tpu.memory_space<vmem>>, vector<1x1x128xf32>
    %189 = vector.shape_cast %188 : vector<1x1x128xf32> to vector<1x128xf32>
    %190 = vector.broadcast %189 : vector<1x128xf32> to vector<8x128xf32>
    %191 = arith.addf %187, %190 : vector<8x128xf32>
    %cst_137 = arith.constant 0.000000e+00 : f32
    %192 = vector.broadcast %cst_137 : f32 to vector<8x128xf32>
    %193 = arith.maximumf %191, %192 : vector<8x128xf32>
    %c13_138 = arith.constant 13 : index
    %c0_139 = arith.constant 0 : index
    %c0_140 = arith.constant 0 : index
    %194 = vector.load %arg4[%c13_138, %c0_139, %c0_140] : memref<16x128x32xf32, #tpu.memory_space<vmem>>, vector<1x128x32xf32>
    %195 = vector.shape_cast %194 : vector<1x128x32xf32> to vector<128x32xf32>
    %cst_141 = arith.constant dense<0.000000e+00> : vector<8x32xf32>
    %196 = tpu.matmul %193, %195, %cst_141 {dimension_numbers = #tpu.dot_dimension_numbers<[1], [0], [0], [1], [0, 0, 1, 1], [], []>} : vector<8x128xf32>, vector<128x32xf32>, vector<8x32xf32> -> vector<8x32xf32>
    %197 = arith.addf %183, %196 : vector<8x32xf32>
    %c14 = arith.constant 14 : index
    %c0_142 = arith.constant 0 : index
    %c0_143 = arith.constant 0 : index
    %198 = vector.load %arg2[%c14, %c0_142, %c0_143] : memref<16x1x128xf32, #tpu.memory_space<vmem>>, vector<1x1x128xf32>
    %199 = vector.shape_cast %198 : vector<1x1x128xf32> to vector<1x128xf32>
    %200 = vector.broadcast %199 : vector<1x128xf32> to vector<8x128xf32>
    %201 = arith.mulf %0, %200 : vector<8x128xf32>
    %c14_144 = arith.constant 14 : index
    %c0_145 = arith.constant 0 : index
    %c0_146 = arith.constant 0 : index
    %202 = vector.load %arg3[%c14_144, %c0_145, %c0_146] : memref<16x1x128xf32, #tpu.memory_space<vmem>>, vector<1x1x128xf32>
    %203 = vector.shape_cast %202 : vector<1x1x128xf32> to vector<1x128xf32>
    %204 = vector.broadcast %203 : vector<1x128xf32> to vector<8x128xf32>
    %205 = arith.addf %201, %204 : vector<8x128xf32>
    %cst_147 = arith.constant 0.000000e+00 : f32
    %206 = vector.broadcast %cst_147 : f32 to vector<8x128xf32>
    %207 = arith.maximumf %205, %206 : vector<8x128xf32>
    %c14_148 = arith.constant 14 : index
    %c0_149 = arith.constant 0 : index
    %c0_150 = arith.constant 0 : index
    %208 = vector.load %arg4[%c14_148, %c0_149, %c0_150] : memref<16x128x32xf32, #tpu.memory_space<vmem>>, vector<1x128x32xf32>
    %209 = vector.shape_cast %208 : vector<1x128x32xf32> to vector<128x32xf32>
    %cst_151 = arith.constant dense<0.000000e+00> : vector<8x32xf32>
    %210 = tpu.matmul %207, %209, %cst_151 {dimension_numbers = #tpu.dot_dimension_numbers<[1], [0], [0], [1], [0, 0, 1, 1], [], []>} : vector<8x128xf32>, vector<128x32xf32>, vector<8x32xf32> -> vector<8x32xf32>
    %211 = arith.addf %197, %210 : vector<8x32xf32>
    %c15 = arith.constant 15 : index
    %c0_152 = arith.constant 0 : index
    %c0_153 = arith.constant 0 : index
    %212 = vector.load %arg2[%c15, %c0_152, %c0_153] : memref<16x1x128xf32, #tpu.memory_space<vmem>>, vector<1x1x128xf32>
    %213 = vector.shape_cast %212 : vector<1x1x128xf32> to vector<1x128xf32>
    %214 = vector.broadcast %213 : vector<1x128xf32> to vector<8x128xf32>
    %215 = arith.mulf %0, %214 : vector<8x128xf32>
    %c15_154 = arith.constant 15 : index
    %c0_155 = arith.constant 0 : index
    %c0_156 = arith.constant 0 : index
    %216 = vector.load %arg3[%c15_154, %c0_155, %c0_156] : memref<16x1x128xf32, #tpu.memory_space<vmem>>, vector<1x1x128xf32>
    %217 = vector.shape_cast %216 : vector<1x1x128xf32> to vector<1x128xf32>
    %218 = vector.broadcast %217 : vector<1x128xf32> to vector<8x128xf32>
    %219 = arith.addf %215, %218 : vector<8x128xf32>
    %cst_157 = arith.constant 0.000000e+00 : f32
    %220 = vector.broadcast %cst_157 : f32 to vector<8x128xf32>
    %221 = arith.maximumf %219, %220 : vector<8x128xf32>
    %c15_158 = arith.constant 15 : index
    %c0_159 = arith.constant 0 : index
    %c0_160 = arith.constant 0 : index
    %222 = vector.load %arg4[%c15_158, %c0_159, %c0_160] : memref<16x128x32xf32, #tpu.memory_space<vmem>>, vector<1x128x32xf32>
    %223 = vector.shape_cast %222 : vector<1x128x32xf32> to vector<128x32xf32>
    %cst_161 = arith.constant dense<0.000000e+00> : vector<8x32xf32>
    %224 = tpu.matmul %221, %223, %cst_161 {dimension_numbers = #tpu.dot_dimension_numbers<[1], [0], [0], [1], [0, 0, 1, 1], [], []>} : vector<8x128xf32>, vector<128x32xf32>, vector<8x32xf32> -> vector<8x32xf32>
    %225 = arith.addf %211, %224 : vector<8x32xf32>
    %c0_162 = arith.constant 0 : index
    %c0_163 = arith.constant 0 : index
    %226 = vector.load %arg5[%c0_162, %c0_163] : memref<1x32xf32, #tpu.memory_space<vmem>>, vector<1x32xf32>
    %227 = vector.broadcast %226 : vector<1x32xf32> to vector<8x32xf32>
    %228 = arith.addf %225, %227 : vector<8x32xf32>
    %cst_164 = arith.constant 0.000000e+00 : f32
    %229 = vector.broadcast %cst_164 : f32 to vector<8x32xf32>
    %230 = arith.maximumf %228, %229 : vector<8x32xf32>
    %c0_165 = arith.constant 0 : index
    %c0_166 = arith.constant 0 : index
    %231 = vector.load %arg6[%c0_165, %c0_166] : memref<1x32xf32, #tpu.memory_space<vmem>>, vector<1x32xf32>
    %232 = vector.broadcast %231 : vector<1x32xf32> to vector<8x32xf32>
    %233 = arith.mulf %230, %232 : vector<8x32xf32>
    %cst_167 = arith.constant dense<0.000000e+00> : vector<8xf32>
    %234 = vector.multi_reduction <add>, %233, %cst_167 [1] : vector<8x32xf32> to vector<8xf32>
    %235 = vector.shape_cast %234 : vector<8xf32> to vector<8x1xf32>
    %c0_168 = arith.constant 0 : index
    %c0_169 = arith.constant 0 : index
    %236 = vector.load %arg7[%c0_168, %c0_169] : memref<1x1xf32, #tpu.memory_space<vmem>>, vector<1x1xf32>
    %237 = vector.broadcast %236 : vector<1x1xf32> to vector<8x1xf32>
    %238 = arith.addf %235, %237 : vector<8x1xf32>
    %239 = vector.shape_cast %238 : vector<8x1xf32> to vector<8x1xf32>
    %240 = vector.broadcast %239 : vector<8x1xf32> to vector<8x128xf32>
    %c0_170 = arith.constant 0 : index
    %c0_171 = arith.constant 0 : index
    %241 = vector.load %arg8[%c0_170, %c0_171] : memref<8x128xf32, #tpu.memory_space<vmem>>, vector<8x128xf32>
    tpu.vector_store %arg8[%c0_170, %c0_171], %240 {strides = array<i32>} : memref<8x128xf32, #tpu.memory_space<vmem>>, vector<8x128xf32>,
    return
  }
  func.func @transform_0(%arg0: i32) -> (i32, i32) {
    %c0_i32 = arith.constant 0 : i32
    %c0_i32_0 = arith.constant 0 : i32
    return %arg0, %c0_i32 : i32, i32
  }
  func.func @transform_1(%arg0: i32) -> (i32, i32, i32) {
    %c0_i32 = arith.constant 0 : i32
    %c0_i32_0 = arith.constant 0 : i32
    %c0_i32_1 = arith.constant 0 : i32
    %c0_i32_2 = arith.constant 0 : i32
    return %c0_i32, %c0_i32_0, %c0_i32_1 : i32, i32, i32
  }
  func.func @transform_2(%arg0: i32) -> (i32, i32, i32) {
    %c0_i32 = arith.constant 0 : i32
    %c0_i32_0 = arith.constant 0 : i32
    %c0_i32_1 = arith.constant 0 : i32
    %c0_i32_2 = arith.constant 0 : i32
    return %c0_i32, %c0_i32_0, %c0_i32_1 : i32, i32, i32
  }
  func.func @transform_3(%arg0: i32) -> (i32, i32, i32) {
    %c0_i32 = arith.constant 0 : i32
    %c0_i32_0 = arith.constant 0 : i32
    %c0_i32_1 = arith.constant 0 : i32
    %c0_i32_2 = arith.constant 0 : i32
    return %c0_i32, %c0_i32_0, %c0_i32_1 : i32, i32, i32
  }
  func.func @transform_4(%arg0: i32) -> (i32, i32) {
    %c0_i32 = arith.constant 0 : i32
    %c0_i32_0 = arith.constant 0 : i32
    %c0_i32_1 = arith.constant 0 : i32
    return %c0_i32, %c0_i32_0 : i32, i32
  }
  func.func @transform_5(%arg0: i32) -> (i32, i32) {
    %c0_i32 = arith.constant 0 : i32
    %c0_i32_0 = arith.constant 0 : i32
    %c0_i32_1 = arith.constant 0 : i32
    return %c0_i32, %c0_i32_0 : i32, i32
  }
  func.func @transform_6(%arg0: i32) -> (i32, i32) {
    %c0_i32 = arith.constant 0 : i32
    %c0_i32_0 = arith.constant 0 : i32
    %c0_i32_1 = arith.constant 0 : i32
    return %c0_i32, %c0_i32_0 : i32, i32
  }
  func.func @transform_7(%arg0: i32) -> (i32, i32) {
    %c0_i32 = arith.constant 0 : i32
    %c0_i32_0 = arith.constant 0 : i32
    return %arg0, %c0_i32 : i32, i32
  }
}

</mosaic_0001>

<bundles_post_ra>
// kernel: cnn_model_forward.1
= control target key start
LH: loop header
LB: loop body
LE: loop exit
PB: predicated region body
PF: predicated region fallthrough
CT: control target
= control target key end

     0   :  { %v3302_v0 = vmov 0.0|0.0   ;;  %vm3303_vm0 = vmmov 0   ;;  %v3304_v8 = vmov 0.0   ;;  %vm1753_vm1 = vcmask 261120   ;;  %s4408_s3 = inlined_call_operand.vmem [shape: f32[16,128,32], index: 3, kind: input, shape index: {}]   ;;  %s4409_s0 = inlined_call_operand.vmem [shape: f32[8,128], index: 0, kind: input, shape index: {}]   ;;  %s4410_s1 = inlined_call_operand.vmem [shape: f32[16,1,128], index: 1, kind: input, shape index: {}]   ;;  %s4411_s2 = inlined_call_operand.vmem [shape: f32[16,1,128], index: 2, kind: input, shape index: {}]   ;;  %s4412_s6 = inlined_call_operand.<no memory space> [shape: f32[1,1], index: 6, kind: input, shape index: {}]   ;;  %s4413_s4 = inlined_call_operand.vmem [shape: f32[1,32], index: 4, kind: input, shape index: {}]   ;;  %s4414_s5 = inlined_call_operand.vmem [shape: f32[1,32], index: 5, kind: input, shape index: {}]   ;;  %s4415_s7 = inlined_call_operand.vmem [shape: f32[8,128], index: 7, kind: output, shape index: {}]  }
   0x1   :  { %2912 = vmatprep.subr.bf16.mxu0 %v3302_v0  ;;  %v1781_v1 = vld [vmem:[%s4408_s3 + $0x80] sm:$0xff]  ;;  %v1782_v2 = vld [vmem:[%s4408_s3 + $0x88] sm:$0xff]  ;;  %2936 = vmatprep.subr.bf16.mxu1 %v3302_v0  ;;  %v1783_v6 = vld [vmem:[%s4408_s3 + $0x90] sm:$0xff] }
   0x2   :  { %v46_v3 = vld [vmem:[%s4408_s3] sm:$0xff]  ;;  %v2913_v4 = vpack.c.bf16 %v1782_v2, %v1781_v1  ;;  %v47_v5 = vld [vmem:[%s4408_s3 + $0x8] sm:$0xff]  ;;  %v1784_v7 = vld [vmem:[%s4408_s3 + $0x98] sm:$0xff]  ;;  %2384 = vmatprep.mubr.msk.f32.mxu0 %vm3303_vm0, %v3304_v8  ;;  %2419 = vmatprep.mubr.msk.f32.mxu1 %vm3303_vm0, %v3304_v8 }
   0x3   :  { %v2937_v9 = vpack.c.bf16 %v47_v5, %v46_v3  ;;  %v48_v10 = vld [vmem:[%s4408_s3 + $0x10] sm:$0xff]  ;;  %v49_v11 = vld [vmem:[%s4408_s3 + $0x18] sm:$0xff]  ;;  %v2916_v12 = vpack.c.bf16 %v1784_v7, %v1783_v6  ;;  %v1785_v14 = vld [vmem:[%s4408_s3 + $0xa0] sm:$0xff] }
   0x4   :  { %2914 = vmatpush3.bf16.msra.mxu0 %v2913_v4  ;;  %v2940_v13 = vpack.c.bf16 %v49_v11, %v48_v10  ;;  %v1786_v15 = vld [vmem:[%s4408_s3 + $0xa8] sm:$0xff]  ;;  %v50_v16 = vld [vmem:[%s4408_s3 + $0x20] sm:$0xff]  ;;  %v1787_v20 = vld [vmem:[%s4408_s3 + $0xb0] sm:$0xff] }
   0x5   :  { %2938 = vmatpush3.bf16.msra.mxu1 %v2937_v9  ;;  %2915 = vmatprep.subr.bf16.mxu0 %v3302_v0  ;;  %v51_v17 = vld [vmem:[%s4408_s3 + $0x28] sm:$0xff]  ;;  %v2919_v18 = vpack.c.bf16 %v1786_v15, %v1785_v14  ;;  %v1788_v21 = vld [vmem:[%s4408_s3 + $0xb8] sm:$0xff]  ;;  %v52_v22 = vld [vmem:[%s4408_s3 + $0x30] sm:$0xff] }
   0x6   :  { %2939 = vmatprep.subr.bf16.mxu1 %v3302_v0  ;;  %v2943_v19 = vpack.c.bf16 %v51_v17, %v50_v16  ;;  %v53_v23 = vld [vmem:[%s4408_s3 + $0x38] sm:$0xff]  ;;  %v2922_v24 = vpack.c.bf16 %v1788_v21, %v1787_v20  ;;  %v1789_v26 = vld [vmem:[%s4408_s3 + $0xc0] sm:$0xff]  ;;  %v1790_v27 = vld [vmem:[%s4408_s3 + $0xc8] sm:$0xff] }
   0x7   :  { %v2946_v25 = vpack.c.bf16 %v53_v23, %v52_v22  ;;  %v54_v28 = vld [vmem:[%s4408_s3 + $0x40] sm:$0xff]  ;;  %v55_v29 = vld [vmem:[%s4408_s3 + $0x48] sm:$0xff]  ;;  %v2925_v30 = vpack.c.bf16 %v1790_v27, %v1789_v26  ;;  %v1791_v32 = vld [vmem:[%s4408_s3 + $0xd0] sm:$0xff] }
   0x8   :  { %2917 = vmatpush3.bf16.msra.mxu0 %v2916_v12  ;;  %v2949_v31 = vpack.c.bf16 %v55_v29, %v54_v28  ;;  %v1792_v33 = vld [vmem:[%s4408_s3 + $0xd8] sm:$0xff]  ;;  %v56_v34 = vld [vmem:[%s4408_s3 + $0x50] sm:$0xff]  ;;  %v3435_v37 = vld [vmem:[%s4409_s0] sm:$0xff] }
   0x9   :  { %2941 = vmatpush3.bf16.msra.mxu1 %v2940_v13  ;;  %2918 = vmatprep.subr.bf16.mxu0 %v3302_v0  ;;  %v57_v35 = vld [vmem:[%s4408_s3 + $0x58] sm:$0xff]  ;;  %v2928_v36 = vpack.c.bf16 %v1792_v33, %v1791_v32  ;;  %v1778_v38 = vld [vmem:[%s4410_s1 + $0x1] ss:$0 sm:$0xff]  ;;  %v1794_v41 = vld [vmem:[%s4408_s3 + $0xe8] sm:$0xff] }
   0xa   :  { %2942 = vmatprep.subr.bf16.mxu1 %v3302_v0  ;;  %v2952_v39 = vpack.c.bf16 %v57_v35, %v56_v34  ;;  %v1793_v40 = vld [vmem:[%s4408_s3 + $0xe0] sm:$0xff]  ;;  %v59_v44 = vld [vmem:[%s4408_s3 + $0x68] sm:$0xff]  ;;  %v70_v45 = vmul.f32 %v1778_v38, %v3435_v37  ;;  %v1795_v50 = vld [vmem:[%s4408_s3 + $0xf0] sm:$0xff] }
   0xb   :  { %v1775_v42 = vld [vmem:[%s4410_s1] ss:$0 sm:$0xff]  ;;  %v2931_v46 = vpack.c.bf16 %v1794_v41, %v1793_v40  ;;  %v1780_v47 = vld [vmem:[%s4411_s2 + $0x1] ss:$0 sm:$0xff]  ;;  %v1796_v51 = vld [vmem:[%s4408_s3 + $0xf8] sm:$0xff] }
   0xc   :  { %2920 = vmatpush3.bf16.msra.mxu0 %v2919_v18  ;;  %v58_v43 = vld [vmem:[%s4408_s3 + $0x60] sm:$0xff]  ;;  %v36_v48 = vmul.f32 %v1775_v42, %v3435_v37  ;;  %v60_v53 = vld [vmem:[%s4408_s3 + $0x70] sm:$0xff]  ;;  %v61_v54 = vld [vmem:[%s4408_s3 + $0x78] sm:$0xff]  ;;  %v79_v55 = vadd.f32 %v1780_v47, %v70_v45  ;;  %v2934_v56 = vpack.c.bf16 %v1796_v51, %v1795_v50 }
   0xd   :  { %2944 = vmatpush3.bf16.msra.mxu1 %v2943_v19  ;;  %2921 = vmatprep.subr.bf16.mxu0 %v3302_v0  ;;  %v2955_v49 = vpack.c.bf16 %v59_v44, %v58_v43  ;;  %v1776_v52 = vld [vmem:[%s4411_s2] ss:$0 sm:$0xff]  ;;  %v2958_v58 = vpack.c.bf16 %v61_v54, %v60_v53  ;;  %v1802_v60 = vld [vmem:[%s4408_s3 + $0x108] sm:$0xff]  ;;  %v1803_v4 = vld [vmem:[%s4408_s3 + $0x110] sm:$0xff] }
   0xe   :  { %2945 = vmatprep.subr.bf16.mxu1 %v3302_v0  ;;  %v44_v57 = vadd.f32 %v1776_v52, %v36_v48  ;;  %v1801_v59 = vld [vmem:[%s4408_s3 + $0x100] sm:$0xff]  ;;  %v1822_v62 = vld [vmem:[%s4408_s3 + $0x188] sm:$0xff]  ;;  %v80_v63 = vmax.f32 %v79_v55, 0.0  ;;  %v1804_v5 = vld [vmem:[%s4408_s3 + $0x118] sm:$0xff] }
   0xf   :  { %v1821_v61 = vld [vmem:[%s4408_s3 + $0x180] sm:$0xff]  ;;  %v2961_v2 = vpack.c.bf16 %v1802_v60, %v1801_v59  ;;  %v1823_v6 = vld [vmem:[%s4408_s3 + $0x190] sm:$0xff]  ;;  %v1824_v7 = vld [vmem:[%s4408_s3 + $0x198] sm:$0xff]  ;;  %v2964_v9 = vpack.c.bf16 %v1804_v5, %v1803_v4 }
  0x10   :  { %2923 = vmatpush3.bf16.msra.mxu0 %v2922_v24  ;;  %v45_v1 = vmax.f32 %v44_v57, 0.0  ;;  %v2985_v3 = vpack.c.bf16 %v1822_v62, %v1821_v61  ;;  %v2988_v10 = vpack.c.bf16 %v1824_v7, %v1823_v6  ;;  %v1805_v11 = vld [vmem:[%s4408_s3 + $0x120] sm:$0xff]  ;;  %v1806_v12 = vld [vmem:[%s4408_s3 + $0x128] sm:$0xff]  ;;  %v1807_v17 = vld [vmem:[%s4408_s3 + $0x130] sm:$0xff] }
  0x11   :  { %2947 = vmatpush3.bf16.msra.mxu1 %v2946_v25  ;;  %2924 = vmatprep.subr.bf16.mxu0 %v3302_v0  ;;  %v1825_v13 = vld [vmem:[%s4408_s3 + $0x1a0] sm:$0xff]  ;;  %v1826_v14 = vld [vmem:[%s4408_s3 + $0x1a8] sm:$0xff]  ;;  %v2967_v15 = vpack.c.bf16 %v1806_v12, %v1805_v11  ;;  %v1808_v18 = vld [vmem:[%s4408_s3 + $0x138] sm:$0xff] }
  0x12   :  { %2948 = vmatprep.subr.bf16.mxu1 %v3302_v0  ;;  %v2991_v16 = vpack.c.bf16 %v1826_v14, %v1825_v13  ;;  %v1827_v19 = vld [vmem:[%s4408_s3 + $0x1b0] sm:$0xff]  ;;  %v1828_v20 = vld [vmem:[%s4408_s3 + $0x1b8] sm:$0xff]  ;;  %v2970_v21 = vpack.c.bf16 %v1808_v18, %v1807_v17  ;;  %v1809_v23 = vld [vmem:[%s4408_s3 + $0x140] sm:$0xff] }
  0x13   :  { %v2994_v22 = vpack.c.bf16 %v1828_v20, %v1827_v19  ;;  %v1810_v24 = vld [vmem:[%s4408_s3 + $0x148] sm:$0xff]  ;;  %v1829_v25 = vld [vmem:[%s4408_s3 + $0x1c0] sm:$0xff]  ;;  %v1811_v29 = vld [vmem:[%s4408_s3 + $0x150] sm:$0xff] }
  0x14   :  { %2926 = vmatpush3.bf16.msra.mxu0 %v2925_v30  ;;  %v1830_v26 = vld [vmem:[%s4408_s3 + $0x1c8] sm:$0xff]  ;;  %v2973_v27 = vpack.c.bf16 %v1810_v24, %v1809_v23  ;;  %v1812_v30 = vld [vmem:[%s4408_s3 + $0x158] sm:$0xff]  ;;  %v1798_v34 = vld [vmem:[%s4410_s1 + $0x2] ss:$0 sm:$0xff] }
  0x15   :  { %2950 = vmatpush3.bf16.msra.mxu1 %v2949_v31  ;;  %2927 = vmatprep.subr.bf16.mxu0 %v3302_v0  ;;  %v2997_v28 = vpack.c.bf16 %v1830_v26, %v1829_v25  ;;  %v1831_v31 = vld [vmem:[%s4408_s3 + $0x1d0] sm:$0xff]  ;;  %v1832_v32 = vld [vmem:[%s4408_s3 + $0x1d8] sm:$0xff]  ;;  %v2976_v33 = vpack.c.bf16 %v1812_v30, %v1811_v29  ;;  %v1814_v38 = vld [vmem:[%s4408_s3 + $0x168] sm:$0xff]  ;;  %v246_v42 = vmul.f32 %v1798_v34, %v3435_v37 }
  0x16   :  { %2951 = vmatprep.subr.bf16.mxu1 %v3302_v0  ;;  %v3000_v35 = vpack.c.bf16 %v1832_v32, %v1831_v31  ;;  %v1833_v40 = vld [vmem:[%s4408_s3 + $0x1e0] sm:$0xff]  ;;  %v1834_v41 = vld [vmem:[%s4408_s3 + $0x1e8] sm:$0xff]  ;;  %v1815_v47 = vld [vmem:[%s4408_s3 + $0x170] sm:$0xff] }
  0x17   :  { %v1800_v44 = vld [vmem:[%s4411_s2 + $0x2] ss:$0 sm:$0xff]  ;;  %v1816_v48 = vld [vmem:[%s4408_s3 + $0x178] sm:$0xff]  ;;  %v1835_v50 = vld [vmem:[%s4408_s3 + $0x1f0] sm:$0xff] }
  0x18   :  { %2929 = vmatpush3.bf16.msra.mxu0 %v2928_v36  ;;  %v1813_v36 = vld [vmem:[%s4408_s3 + $0x160] sm:$0xff]  ;;  %v1836_v51 = vld [vmem:[%s4408_s3 + $0x1f8] sm:$0xff]  ;;  %v255_v52 = vadd.f32 %v1800_v44, %v246_v42  ;;  %v2982_v53 = vpack.c.bf16 %v1816_v48, %v1815_v47  ;;  %v1842_v57 = vld [vmem:[%s4408_s3 + $0x208] sm:$0xff] }
  0x19   :  { %2953 = vmatpush3.bf16.msra.mxu1 %v2952_v39  ;;  %2930 = vmatprep.subr.bf16.mxu0 %v3302_v0  ;;  %v1818_v39 = vld [vmem:[%s4410_s1 + $0x3] ss:$0 sm:$0xff]  ;;  %v2979_v43 = vpack.c.bf16 %v1814_v38, %v1813_v36  ;;  %v3006_v55 = vpack.c.bf16 %v1836_v51, %v1835_v50  ;;  %v1862_v59 = vld [vmem:[%s4408_s3 + $0x288] sm:$0xff]  ;;  %v1864_v4 = vld [vmem:[%s4408_s3 + $0x298] sm:$0xff] }
  0x1a   :  { %2954 = vmatprep.subr.bf16.mxu1 %v3302_v0  ;;  %v353_v45 = vmul.f32 %v1818_v39, %v3435_v37  ;;  %v256_v60 = vmax.f32 %v255_v52, 0.0  ;;  %v1845_v7 = vld [vmem:[%s4408_s3 + $0x220] sm:$0xff]  ;;  %v1866_v11 = vld [vmem:[%s4408_s3 + $0x2a8] sm:$0xff]  ;;  %v1847_v14 = vld [vmem:[%s4408_s3 + $0x230] sm:$0xff] }
  0x1b   :  { %v1868_v17 = vld [vmem:[%s4408_s3 + $0x2b8] sm:$0xff]  ;;  %v1849_v20 = vld [vmem:[%s4408_s3 + $0x240] sm:$0xff]  ;;  %v1870_v23 = vld [vmem:[%s4408_s3 + $0x2c8] sm:$0xff] }
  0x1c   :  { %2932 = vmatpush3.bf16.msra.mxu0 %v2931_v46  ;;  %v3003_v46 = vpack.c.bf16 %v1834_v41, %v1833_v40  ;;  %v1851_v26 = vld [vmem:[%s4408_s3 + $0x250] sm:$0xff]  ;;  %v1872_v29 = vld [vmem:[%s4408_s3 + $0x2d8] sm:$0xff]  ;;  %v1838_v31 = vld [vmem:[%s4410_s1 + $0x4] ss:$0 sm:$0xff] }
  0x1d   :  { %2956 = vmatpush3.bf16.msra.mxu1 %v2955_v49  ;;  %2933 = vmatprep.subr.bf16.mxu0 %v3302_v0  ;;  %v1820_v49 = vld [vmem:[%s4411_s2 + $0x3] ss:$0 sm:$0xff]  ;;  %v1854_v34 = vld [vmem:[%s4408_s3 + $0x268] sm:$0xff]  ;;  %v460_v39 = vmul.f32 %v1838_v31, %v3435_v37  ;;  %v1840_v41 = vld [vmem:[%s4411_s2 + $0x4] ss:$0 sm:$0xff] }
  0x1e   :  { %2957 = vmatprep.subr.bf16.mxu1 %v3302_v0  ;;  %v362_v54 = vadd.f32 %v1820_v49, %v353_v45  ;;  %v1873_v36 = vld [vmem:[%s4408_s3 + $0x2e0] sm:$0xff]  ;;  %v1874_v38 = vld [vmem:[%s4408_s3 + $0x2e8] sm:$0xff]  ;;  %v1855_v44 = vld [vmem:[%s4408_s3 + $0x270] sm:$0xff] }
  0x1f   :  { %v1856_v45 = vld [vmem:[%s4408_s3 + $0x278] sm:$0xff]  ;;  %v1875_v47 = vld [vmem:[%s4408_s3 + $0x2f0] sm:$0xff]  ;;  %v469_v49 = vadd.f32 %v1840_v41, %v460_v39  ;;  %v1894_v31 = vld [vmem:[%s4408_s3 + $0x368] sm:$0xff] }
  0x20   :  { %2935 = vmatpush3.bf16.msra.mxu0 %v2934_v56  ;;  %v1841_v56 = vld [vmem:[%s4408_s3 + $0x200] sm:$0xff]  ;;  %v363_v62 = vmax.f32 %v362_v54, 0.0  ;;  %v1876_v48 = vld [vmem:[%s4408_s3 + $0x2f8] sm:$0xff]  ;;  %v3030_v50 = vpack.c.bf16 %v1856_v45, %v1855_v44  ;;  %v1882_v54 = vld [vmem:[%s4408_s3 + $0x308] sm:$0xff] }
  0x21   :  { %2959 = vmatpush3.bf16.msra.mxu1 %v2958_v58  ;;  %2960 = vmatprep.subr.bf16.mxu0 %v3302_v0  ;;  %v1861_v58 = vld [vmem:[%s4408_s3 + $0x280] sm:$0xff]  ;;  %v3009_v61 = vpack.c.bf16 %v1842_v57, %v1841_v56  ;;  %v3054_v52 = vpack.c.bf16 %v1876_v48, %v1875_v47  ;;  %v1902_v56 = vld [vmem:[%s4408_s3 + $0x388] sm:$0xff]  ;;  %v470_v57 = vmax.f32 %v469_v49, 0.0  ;;  %v1895_v41 = vld [vmem:[%s4408_s3 + $0x370] sm:$0xff] }
  0x22   :  { %2984 = vmatprep.subr.bf16.mxu1 %v3302_v0  ;;  %v1915_v44 = vld [vmem:[%s4408_s3 + $0x3f0] sm:$0xff]  ;;  %v1916_v45 = vld [vmem:[%s4408_s3 + $0x3f8] sm:$0xff] }
  0x23   :  { %2385 = vmatmul.mubr.f32.vlgmr.msra.gmra.mrb[0].mxu0 %v80_v63  ;;  %v3033_v63 = vpack.c.bf16 %v1862_v59, %v1861_v58  ;;  %v3102_v49 = vpack.c.bf16 %v1916_v45, %v1915_v44 }
  0x24   :  { %2420 = vmatmul.mubr.f32.vlgmr.msra.gmra.mrb[0].mxu1 %v45_v1  ;;  %2962 = vmatpush3.bf16.msra.mxu0 %v2961_v2  ;;  %v1843_v1 = vld [vmem:[%s4408_s3 + $0x210] sm:$0xff]  ;;  %v1844_v2 = vld [vmem:[%s4408_s3 + $0x218] sm:$0xff] }
  0x25   :  { %2986 = vmatpush3.bf16.msra.mxu1 %v2985_v3  ;;  %2963 = vmatprep.subr.bf16.mxu0 %v3302_v0  ;;  %v1863_v3 = vld [vmem:[%s4408_s3 + $0x290] sm:$0xff]  ;;  %v3012_v5 = vpack.c.bf16 %v1844_v2, %v1843_v1  ;;  %v1904_v1 = vld [vmem:[%s4408_s3 + $0x398] sm:$0xff] }
  0x26   :  { %2987 = vmatprep.subr.bf16.mxu1 %v3302_v0  ;;  %2454 = vmatprep.mubr.msk.f32.mxu0 %vm3303_vm0, %v3304_v8  ;;  %v3036_v6 = vpack.c.bf16 %v1864_v4, %v1863_v3  ;;  %v1885_v4 = vld [vmem:[%s4408_s3 + $0x320] sm:$0xff] }
  0x27   :  { %2489 = vmatprep.mubr.msk.f32.mxu1 %vm3303_vm0, %v3304_v8 }
  0x28   :  { %2965 = vmatpush3.bf16.msra.mxu0 %v2964_v9  ;;  %v1846_v9 = vld [vmem:[%s4408_s3 + $0x228] sm:$0xff] }
  0x29   :  { %2989 = vmatpush3.bf16.msra.mxu1 %v2988_v10  ;;  %2966 = vmatprep.subr.bf16.mxu0 %v3302_v0  ;;  %v1865_v10 = vld [vmem:[%s4408_s3 + $0x2a0] sm:$0xff]  ;;  %v3015_v12 = vpack.c.bf16 %v1846_v9, %v1845_v7  ;;  %v1906_v7 = vld [vmem:[%s4408_s3 + $0x3a8] sm:$0xff] }
  0x2a   :  { %2990 = vmatprep.subr.bf16.mxu1 %v3302_v0  ;;  %v3039_v13 = vpack.c.bf16 %v1866_v11, %v1865_v10  ;;  %v1887_v11 = vld [vmem:[%s4408_s3 + $0x330] sm:$0xff] }
  0x2c   :  { %2968 = vmatpush3.bf16.msra.mxu0 %v2967_v15  ;;  %v1848_v15 = vld [vmem:[%s4408_s3 + $0x238] sm:$0xff] }
  0x2d   :  { %2992 = vmatpush3.bf16.msra.mxu1 %v2991_v16  ;;  %2969 = vmatprep.subr.bf16.mxu0 %v3302_v0  ;;  %v1867_v16 = vld [vmem:[%s4408_s3 + $0x2b0] sm:$0xff]  ;;  %v3018_v18 = vpack.c.bf16 %v1848_v15, %v1847_v14  ;;  %v1908_v14 = vld [vmem:[%s4408_s3 + $0x3b8] sm:$0xff] }
  0x2e   :  { %2993 = vmatprep.subr.bf16.mxu1 %v3302_v0  ;;  %v3042_v19 = vpack.c.bf16 %v1868_v17, %v1867_v16  ;;  %v1889_v17 = vld [vmem:[%s4408_s3 + $0x340] sm:$0xff] }
  0x30   :  { %2971 = vmatpush3.bf16.msra.mxu0 %v2970_v21  ;;  %v1850_v21 = vld [vmem:[%s4408_s3 + $0x248] sm:$0xff] }
  0x31   :  { %2995 = vmatpush3.bf16.msra.mxu1 %v2994_v22  ;;  %2972 = vmatprep.subr.bf16.mxu0 %v3302_v0  ;;  %v1869_v22 = vld [vmem:[%s4408_s3 + $0x2c0] sm:$0xff]  ;;  %v3021_v24 = vpack.c.bf16 %v1850_v21, %v1849_v20  ;;  %v1910_v20 = vld [vmem:[%s4408_s3 + $0x3c8] sm:$0xff] }
  0x32   :  { %2996 = vmatprep.subr.bf16.mxu1 %v3302_v0  ;;  %v3045_v25 = vpack.c.bf16 %v1870_v23, %v1869_v22  ;;  %v1891_v23 = vld [vmem:[%s4408_s3 + $0x350] sm:$0xff] }
  0x34   :  { %2974 = vmatpush3.bf16.msra.mxu0 %v2973_v27  ;;  %v1852_v27 = vld [vmem:[%s4408_s3 + $0x258] sm:$0xff] }
  0x35   :  { %2998 = vmatpush3.bf16.msra.mxu1 %v2997_v28  ;;  %2975 = vmatprep.subr.bf16.mxu0 %v3302_v0  ;;  %v1871_v28 = vld [vmem:[%s4408_s3 + $0x2d0] sm:$0xff]  ;;  %v3024_v30 = vpack.c.bf16 %v1852_v27, %v1851_v26  ;;  %v1912_v26 = vld [vmem:[%s4408_s3 + $0x3d8] sm:$0xff] }
  0x36   :  { %2999 = vmatprep.subr.bf16.mxu1 %v3302_v0  ;;  %v3048_v32 = vpack.c.bf16 %v1872_v29, %v1871_v28  ;;  %v1878_v28 = vld [vmem:[%s4410_s1 + $0x6] ss:$0 sm:$0xff] }
  0x38   :  { %2977 = vmatpush3.bf16.msra.mxu0 %v2976_v33  ;;  %v1853_v33 = vld [vmem:[%s4408_s3 + $0x260] sm:$0xff] }
  0x39   :  { %3001 = vmatpush3.bf16.msra.mxu1 %v3000_v35  ;;  %2978 = vmatprep.subr.bf16.mxu0 %v3302_v0  ;;  %v1858_v35 = vld [vmem:[%s4410_s1 + $0x5] ss:$0 sm:$0xff]  ;;  %v3027_v40 = vpack.c.bf16 %v1854_v34, %v1853_v33  ;;  %v1914_v34 = vld [vmem:[%s4408_s3 + $0x3e8] sm:$0xff] }
  0x3a   :  { %3002 = vmatprep.subr.bf16.mxu1 %v3302_v0  ;;  %v567_v42 = vmul.f32 %v1858_v35, %v3435_v37  ;;  %v1913_v33 = vld [vmem:[%s4408_s3 + $0x3e0] sm:$0xff]  ;;  %v674_v35 = vmul.f32 %v1878_v28, %v3435_v37  ;;  %v1934_v28 = vld [vmem:[%s4408_s3 + $0x468] sm:$0xff] }
  0x3c   :  { %2980 = vmatpush3.bf16.msra.mxu0 %v2979_v43  ;;  %v3051_v43 = vpack.c.bf16 %v1874_v38, %v1873_v36  ;;  %v1880_v38 = vld [vmem:[%s4411_s2 + $0x6] ss:$0 sm:$0xff] }
  0x3d   :  { %3004 = vmatpush3.bf16.msra.mxu1 %v3003_v46  ;;  %2981 = vmatprep.subr.bf16.mxu0 %v3302_v0  ;;  %v1860_v46 = vld [vmem:[%s4411_s2 + $0x5] ss:$0 sm:$0xff] }
  0x3e   :  { %3005 = vmatprep.subr.bf16.mxu1 %v3302_v0  ;;  %v576_v51 = vadd.f32 %v1860_v46, %v567_v42  ;;  %v1896_v42 = vld [vmem:[%s4408_s3 + $0x378] sm:$0xff]  ;;  %v683_v46 = vadd.f32 %v1880_v38, %v674_v35  ;;  %v1935_v38 = vld [vmem:[%s4408_s3 + $0x470] sm:$0xff] }
  0x3f   :  { %v3078_v47 = vpack.c.bf16 %v1896_v42, %v1895_v41  ;;  %v1955_v41 = vld [vmem:[%s4408_s3 + $0x4f0] sm:$0xff]  ;;  %v1956_v42 = vld [vmem:[%s4408_s3 + $0x4f8] sm:$0xff] }
  0x40   :  { %2983 = vmatpush3.bf16.msra.mxu0 %v2982_v53  ;;  %v1881_v53 = vld [vmem:[%s4408_s3 + $0x300] sm:$0xff]  ;;  %v577_v59 = vmax.f32 %v576_v51, 0.0  ;;  %v1922_v51 = vld [vmem:[%s4408_s3 + $0x408] sm:$0xff] }
  0x41   :  { %3007 = vmatpush3.bf16.msra.mxu1 %v3006_v55  ;;  %3008 = vmatprep.subr.bf16.mxu0 %v3302_v0  ;;  %v1901_v55 = vld [vmem:[%s4408_s3 + $0x380] sm:$0xff]  ;;  %v3057_v58 = vpack.c.bf16 %v1882_v54, %v1881_v53  ;;  %v1942_v53 = vld [vmem:[%s4408_s3 + $0x488] sm:$0xff]  ;;  %v684_v54 = vmax.f32 %v683_v46, 0.0  ;;  %v3150_v46 = vpack.c.bf16 %v1956_v42, %v1955_v41 }
  0x42   :  { %3032 = vmatprep.subr.bf16.mxu1 %v3302_v0 }
  0x43   :  { %2455 = vmatmul.mubr.f32.vlgmr.msra.gmra.mrb[2].mxu0 %v256_v60  ;;  %v3081_v60 = vpack.c.bf16 %v1902_v56, %v1901_v55 }
  0x44   :  { %3010 = vmatpush3.bf16.msra.mxu0 %v3009_v61  ;;  %2490 = vmatmul.mubr.f32.vlgmr.msra.gmra.mrb[2].mxu1 %v363_v62  ;;  %v1883_v61 = vld [vmem:[%s4408_s3 + $0x310] sm:$0xff]  ;;  %v1884_v62 = vld [vmem:[%s4408_s3 + $0x318] sm:$0xff] }
  0x45   :  { %3034 = vmatpush3.bf16.msra.mxu1 %v3033_v63  ;;  %3011 = vmatprep.subr.bf16.mxu0 %v3302_v0  ;;  %v1903_v63 = vld [vmem:[%s4408_s3 + $0x390] sm:$0xff]  ;;  %v3060_v2 = vpack.c.bf16 %v1884_v62, %v1883_v61  ;;  %v1944_v61 = vld [vmem:[%s4408_s3 + $0x498] sm:$0xff] }
  0x46   :  { %3035 = vmatprep.subr.bf16.mxu1 %v3302_v0  ;;  %2524 = vmatprep.mubr.msk.f32.mxu0 %vm3303_vm0, %v3304_v8  ;;  %v3084_v3 = vpack.c.bf16 %v1904_v1, %v1903_v63  ;;  %v1925_v1 = vld [vmem:[%s4408_s3 + $0x420] sm:$0xff] }
  0x47   :  { %2559 = vmatprep.mubr.msk.f32.mxu1 %vm3303_vm0, %v3304_v8 }
  0x48   :  { %3013 = vmatpush3.bf16.msra.mxu0 %v3012_v5  ;;  %v1886_v5 = vld [vmem:[%s4408_s3 + $0x328] sm:$0xff] }
  0x49   :  { %3037 = vmatpush3.bf16.msra.mxu1 %v3036_v6  ;;  %3014 = vmatprep.subr.bf16.mxu0 %v3302_v0  ;;  %v1905_v6 = vld [vmem:[%s4408_s3 + $0x3a0] sm:$0xff]  ;;  %v3063_v9 = vpack.c.bf16 %v1886_v5, %v1885_v4  ;;  %v1946_v4 = vld [vmem:[%s4408_s3 + $0x4a8] sm:$0xff] }
  0x4a   :  { %3038 = vmatprep.subr.bf16.mxu1 %v3302_v0  ;;  %v3087_v10 = vpack.c.bf16 %v1906_v7, %v1905_v6  ;;  %v1927_v7 = vld [vmem:[%s4408_s3 + $0x430] sm:$0xff] }
  0x4c   :  { %3016 = vmatpush3.bf16.msra.mxu0 %v3015_v12  ;;  %v1888_v12 = vld [vmem:[%s4408_s3 + $0x338] sm:$0xff] }
  0x4d   :  { %3040 = vmatpush3.bf16.msra.mxu1 %v3039_v13  ;;  %3017 = vmatprep.subr.bf16.mxu0 %v3302_v0  ;;  %v1907_v13 = vld [vmem:[%s4408_s3 + $0x3b0] sm:$0xff]  ;;  %v3066_v15 = vpack.c.bf16 %v1888_v12, %v1887_v11  ;;  %v1948_v11 = vld [vmem:[%s4408_s3 + $0x4b8] sm:$0xff] }
  0x4e   :  { %3041 = vmatprep.subr.bf16.mxu1 %v3302_v0  ;;  %v3090_v16 = vpack.c.bf16 %v1908_v14, %v1907_v13  ;;  %v1929_v14 = vld [vmem:[%s4408_s3 + $0x440] sm:$0xff] }
  0x50   :  { %3019 = vmatpush3.bf16.msra.mxu0 %v3018_v18  ;;  %v1890_v18 = vld [vmem:[%s4408_s3 + $0x348] sm:$0xff] }
  0x51   :  { %3043 = vmatpush3.bf16.msra.mxu1 %v3042_v19  ;;  %3020 = vmatprep.subr.bf16.mxu0 %v3302_v0  ;;  %v1909_v19 = vld [vmem:[%s4408_s3 + $0x3c0] sm:$0xff]  ;;  %v3069_v21 = vpack.c.bf16 %v1890_v18, %v1889_v17  ;;  %v1950_v17 = vld [vmem:[%s4408_s3 + $0x4c8] sm:$0xff] }
  0x52   :  { %3044 = vmatprep.subr.bf16.mxu1 %v3302_v0  ;;  %v3093_v22 = vpack.c.bf16 %v1910_v20, %v1909_v19  ;;  %v1931_v20 = vld [vmem:[%s4408_s3 + $0x450] sm:$0xff] }
  0x54   :  { %3022 = vmatpush3.bf16.msra.mxu0 %v3021_v24  ;;  %v1892_v24 = vld [vmem:[%s4408_s3 + $0x358] sm:$0xff] }
  0x55   :  { %3046 = vmatpush3.bf16.msra.mxu1 %v3045_v25  ;;  %3023 = vmatprep.subr.bf16.mxu0 %v3302_v0  ;;  %v1911_v25 = vld [vmem:[%s4408_s3 + $0x3d0] sm:$0xff]  ;;  %v3072_v27 = vpack.c.bf16 %v1892_v24, %v1891_v23  ;;  %v1952_v23 = vld [vmem:[%s4408_s3 + $0x4d8] sm:$0xff] }
  0x56   :  { %3047 = vmatprep.subr.bf16.mxu1 %v3302_v0  ;;  %v3096_v29 = vpack.c.bf16 %v1912_v26, %v1911_v25  ;;  %v1918_v25 = vld [vmem:[%s4410_s1 + $0x8] ss:$0 sm:$0xff] }
  0x58   :  { %3025 = vmatpush3.bf16.msra.mxu0 %v3024_v30  ;;  %v1893_v30 = vld [vmem:[%s4408_s3 + $0x360] sm:$0xff] }
  0x59   :  { %3049 = vmatpush3.bf16.msra.mxu1 %v3048_v32  ;;  %3026 = vmatprep.subr.bf16.mxu0 %v3302_v0  ;;  %v1898_v32 = vld [vmem:[%s4410_s1 + $0x7] ss:$0 sm:$0xff]  ;;  %v3075_v36 = vpack.c.bf16 %v1894_v31, %v1893_v30  ;;  %v1954_v31 = vld [vmem:[%s4408_s3 + $0x4e8] sm:$0xff] }
  0x5a   :  { %3050 = vmatprep.subr.bf16.mxu1 %v3302_v0  ;;  %v781_v39 = vmul.f32 %v1898_v32, %v3435_v37  ;;  %v1953_v30 = vld [vmem:[%s4408_s3 + $0x4e0] sm:$0xff]  ;;  %v888_v32 = vmul.f32 %v1918_v25, %v3435_v37  ;;  %v1974_v25 = vld [vmem:[%s4408_s3 + $0x568] sm:$0xff] }
  0x5c   :  { %3028 = vmatpush3.bf16.msra.mxu0 %v3027_v40  ;;  %v3099_v40 = vpack.c.bf16 %v1914_v34, %v1913_v33  ;;  %v1920_v34 = vld [vmem:[%s4411_s2 + $0x8] ss:$0 sm:$0xff] }
  0x5d   :  { %3052 = vmatpush3.bf16.msra.mxu1 %v3051_v43  ;;  %3029 = vmatprep.subr.bf16.mxu0 %v3302_v0  ;;  %v1900_v43 = vld [vmem:[%s4411_s2 + $0x7] ss:$0 sm:$0xff] }
  0x5e   :  { %3053 = vmatprep.subr.bf16.mxu1 %v3302_v0  ;;  %v790_v48 = vadd.f32 %v1900_v43, %v781_v39  ;;  %v1936_v39 = vld [vmem:[%s4408_s3 + $0x478] sm:$0xff]  ;;  %v897_v43 = vadd.f32 %v1920_v34, %v888_v32  ;;  %v1975_v34 = vld [vmem:[%s4408_s3 + $0x570] sm:$0xff] }
  0x5f   :  { %v3126_v44 = vpack.c.bf16 %v1936_v39, %v1935_v38  ;;  %v1996_v38 = vld [vmem:[%s4408_s3 + $0x5f8] sm:$0xff] }
  0x60   :  { %3031 = vmatpush3.bf16.msra.mxu0 %v3030_v50  ;;  %v1921_v50 = vld [vmem:[%s4408_s3 + $0x400] sm:$0xff]  ;;  %v791_v56 = vmax.f32 %v790_v48, 0.0  ;;  %v1962_v48 = vld [vmem:[%s4408_s3 + $0x508] sm:$0xff] }
  0x61   :  { %3055 = vmatpush3.bf16.msra.mxu1 %v3054_v52  ;;  %3056 = vmatprep.subr.bf16.mxu0 %v3302_v0  ;;  %v1941_v52 = vld [vmem:[%s4408_s3 + $0x480] sm:$0xff]  ;;  %v3105_v55 = vpack.c.bf16 %v1922_v51, %v1921_v50  ;;  %v1982_v50 = vld [vmem:[%s4408_s3 + $0x588] sm:$0xff]  ;;  %v898_v51 = vmax.f32 %v897_v43, 0.0 }
  0x62   :  { %3080 = vmatprep.subr.bf16.mxu1 %v3302_v0  ;;  %v2001_v43 = vld [vmem:[%s4408_s3 + $0x600] sm:$0xff] }
  0x63   :  { %2525 = vmatmul.mubr.f32.vlgmr.msra.gmra.mrb[4].mxu0 %v470_v57  ;;  %v3129_v57 = vpack.c.bf16 %v1942_v53, %v1941_v52 }
  0x64   :  { %3058 = vmatpush3.bf16.msra.mxu0 %v3057_v58  ;;  %2560 = vmatmul.mubr.f32.vlgmr.msra.gmra.mrb[4].mxu1 %v577_v59  ;;  %v1923_v58 = vld [vmem:[%s4408_s3 + $0x410] sm:$0xff]  ;;  %v1924_v59 = vld [vmem:[%s4408_s3 + $0x418] sm:$0xff] }
  0x65   :  { %3082 = vmatpush3.bf16.msra.mxu1 %v3081_v60  ;;  %3059 = vmatprep.subr.bf16.mxu0 %v3302_v0  ;;  %v1943_v60 = vld [vmem:[%s4408_s3 + $0x490] sm:$0xff]  ;;  %v3108_v62 = vpack.c.bf16 %v1924_v59, %v1923_v58  ;;  %v1984_v58 = vld [vmem:[%s4408_s3 + $0x598] sm:$0xff] }
  0x66   :  { %3083 = vmatprep.subr.bf16.mxu1 %v3302_v0  ;;  %2594 = vmatprep.mubr.msk.f32.mxu0 %vm3303_vm0, %v3304_v8  ;;  %v3132_v63 = vpack.c.bf16 %v1944_v61, %v1943_v60  ;;  %v1965_v61 = vld [vmem:[%s4408_s3 + $0x520] sm:$0xff] }
  0x67   :  { %2629 = vmatprep.mubr.msk.f32.mxu1 %vm3303_vm0, %v3304_v8 }
  0x68   :  { %3061 = vmatpush3.bf16.msra.mxu0 %v3060_v2  ;;  %v1926_v2 = vld [vmem:[%s4408_s3 + $0x428] sm:$0xff] }
  0x69   :  { %3085 = vmatpush3.bf16.msra.mxu1 %v3084_v3  ;;  %3062 = vmatprep.subr.bf16.mxu0 %v3302_v0  ;;  %v1945_v3 = vld [vmem:[%s4408_s3 + $0x4a0] sm:$0xff]  ;;  %v3111_v5 = vpack.c.bf16 %v1926_v2, %v1925_v1  ;;  %v1986_v1 = vld [vmem:[%s4408_s3 + $0x5a8] sm:$0xff] }
  0x6a   :  { %3086 = vmatprep.subr.bf16.mxu1 %v3302_v0  ;;  %v3135_v6 = vpack.c.bf16 %v1946_v4, %v1945_v3  ;;  %v1967_v4 = vld [vmem:[%s4408_s3 + $0x530] sm:$0xff] }
  0x6c   :  { %3064 = vmatpush3.bf16.msra.mxu0 %v3063_v9  ;;  %v1928_v9 = vld [vmem:[%s4408_s3 + $0x438] sm:$0xff] }
  0x6d   :  { %3088 = vmatpush3.bf16.msra.mxu1 %v3087_v10  ;;  %3065 = vmatprep.subr.bf16.mxu0 %v3302_v0  ;;  %v1947_v10 = vld [vmem:[%s4408_s3 + $0x4b0] sm:$0xff]  ;;  %v3114_v12 = vpack.c.bf16 %v1928_v9, %v1927_v7  ;;  %v1988_v7 = vld [vmem:[%s4408_s3 + $0x5b8] sm:$0xff] }
  0x6e   :  { %3089 = vmatprep.subr.bf16.mxu1 %v3302_v0  ;;  %v3138_v13 = vpack.c.bf16 %v1948_v11, %v1947_v10  ;;  %v1969_v11 = vld [vmem:[%s4408_s3 + $0x540] sm:$0xff] }
  0x70   :  { %3067 = vmatpush3.bf16.msra.mxu0 %v3066_v15  ;;  %v1930_v15 = vld [vmem:[%s4408_s3 + $0x448] sm:$0xff] }
  0x71   :  { %3091 = vmatpush3.bf16.msra.mxu1 %v3090_v16  ;;  %3068 = vmatprep.subr.bf16.mxu0 %v3302_v0  ;;  %v1949_v16 = vld [vmem:[%s4408_s3 + $0x4c0] sm:$0xff]  ;;  %v3117_v18 = vpack.c.bf16 %v1930_v15, %v1929_v14  ;;  %v1990_v14 = vld [vmem:[%s4408_s3 + $0x5c8] sm:$0xff] }
  0x72   :  { %3092 = vmatprep.subr.bf16.mxu1 %v3302_v0  ;;  %v3141_v19 = vpack.c.bf16 %v1950_v17, %v1949_v16  ;;  %v1971_v17 = vld [vmem:[%s4408_s3 + $0x550] sm:$0xff] }
  0x74   :  { %3070 = vmatpush3.bf16.msra.mxu0 %v3069_v21  ;;  %v1932_v21 = vld [vmem:[%s4408_s3 + $0x458] sm:$0xff] }
  0x75   :  { %3094 = vmatpush3.bf16.msra.mxu1 %v3093_v22  ;;  %3071 = vmatprep.subr.bf16.mxu0 %v3302_v0  ;;  %v1951_v22 = vld [vmem:[%s4408_s3 + $0x4d0] sm:$0xff]  ;;  %v3120_v24 = vpack.c.bf16 %v1932_v21, %v1931_v20  ;;  %v1992_v20 = vld [vmem:[%s4408_s3 + $0x5d8] sm:$0xff] }
  0x76   :  { %3095 = vmatprep.subr.bf16.mxu1 %v3302_v0  ;;  %v3144_v26 = vpack.c.bf16 %v1952_v23, %v1951_v22  ;;  %v1958_v22 = vld [vmem:[%s4410_s1 + $0xa] ss:$0 sm:$0xff] }
  0x78   :  { %3073 = vmatpush3.bf16.msra.mxu0 %v3072_v27  ;;  %v1933_v27 = vld [vmem:[%s4408_s3 + $0x460] sm:$0xff] }
  0x79   :  { %3097 = vmatpush3.bf16.msra.mxu1 %v3096_v29  ;;  %3074 = vmatprep.subr.bf16.mxu0 %v3302_v0  ;;  %v1938_v29 = vld [vmem:[%s4410_s1 + $0x9] ss:$0 sm:$0xff]  ;;  %v3123_v33 = vpack.c.bf16 %v1934_v28, %v1933_v27  ;;  %v1993_v27 = vld [vmem:[%s4408_s3 + $0x5e0] sm:$0xff] }
  0x7a   :  { %3098 = vmatprep.subr.bf16.mxu1 %v3302_v0  ;;  %v995_v35 = vmul.f32 %v1938_v29, %v3435_v37  ;;  %v1994_v28 = vld [vmem:[%s4408_s3 + $0x5e8] sm:$0xff]  ;;  %v1102_v29 = vmul.f32 %v1958_v22, %v3435_v37 }
  0x7b   :  { %v2018_v22 = vld [vmem:[%s4410_s1 + $0xd] ss:$0 sm:$0xff] }
  0x7c   :  { %3076 = vmatpush3.bf16.msra.mxu0 %v3075_v36  ;;  %v3147_v36 = vpack.c.bf16 %v1954_v31, %v1953_v30  ;;  %v1960_v31 = vld [vmem:[%s4411_s2 + $0xa] ss:$0 sm:$0xff] }
  0x7d   :  { %3100 = vmatpush3.bf16.msra.mxu1 %v3099_v40  ;;  %3077 = vmatprep.subr.bf16.mxu0 %v3302_v0  ;;  %v1940_v40 = vld [vmem:[%s4411_s2 + $0x9] ss:$0 sm:$0xff]  ;;  %v1111_v39 = vadd.f32 %v1960_v31, %v1102_v29  ;;  %v2015_v31 = vld [vmem:[%s4408_s3 + $0x670] sm:$0xff] }
  0x7e   :  { %3101 = vmatprep.subr.bf16.mxu1 %v3302_v0  ;;  %v1004_v45 = vadd.f32 %v1940_v40, %v995_v35  ;;  %v1976_v35 = vld [vmem:[%s4408_s3 + $0x578] sm:$0xff] }
  0x7f   :  { %v3174_v40 = vpack.c.bf16 %v1976_v35, %v1975_v34  ;;  %v2035_v34 = vld [vmem:[%s4408_s3 + $0x6f0] sm:$0xff]  ;;  %v2036_v35 = vld [vmem:[%s4408_s3 + $0x6f8] sm:$0xff] }
  0x80   :  { %3079 = vmatpush3.bf16.msra.mxu0 %v3078_v47  ;;  %v1961_v47 = vld [vmem:[%s4408_s3 + $0x500] sm:$0xff]  ;;  %v1005_v53 = vmax.f32 %v1004_v45, 0.0 }
  0x81   :  { %3103 = vmatpush3.bf16.msra.mxu1 %v3102_v49  ;;  %3104 = vmatprep.subr.bf16.mxu0 %v3302_v0  ;;  %v1981_v49 = vld [vmem:[%s4408_s3 + $0x580] sm:$0xff]  ;;  %v3153_v52 = vpack.c.bf16 %v1962_v48, %v1961_v47  ;;  %v1112_v47 = vmax.f32 %v1111_v39, 0.0  ;;  %v3246_v39 = vpack.c.bf16 %v2036_v35, %v2035_v34  ;;  %v2060_v34 = vld [vmem:[%s4411_s2 + $0xf] ss:$0 sm:$0xff]  ;;  %v2076_v35 = vld [vmem:[%s4408_s3 + $0x7f8] sm:$0xff] }
  0x82   :  { %3128 = vmatprep.subr.bf16.mxu1 %v3302_v0  ;;  %v2021_v45 = vld [vmem:[%s4408_s3 + $0x680] sm:$0xff] }
  0x83   :  { %2595 = vmatmul.mubr.f32.vlgmr.msra.gmra.mrb[6].mxu0 %v684_v54  ;;  %v3177_v54 = vpack.c.bf16 %v1982_v50, %v1981_v49 }
  0x84   :  { %3106 = vmatpush3.bf16.msra.mxu0 %v3105_v55  ;;  %2630 = vmatmul.mubr.f32.vlgmr.msra.gmra.mrb[6].mxu1 %v791_v56  ;;  %v1963_v55 = vld [vmem:[%s4408_s3 + $0x510] sm:$0xff]  ;;  %v1964_v56 = vld [vmem:[%s4408_s3 + $0x518] sm:$0xff] }
  0x85   :  { %3130 = vmatpush3.bf16.msra.mxu1 %v3129_v57  ;;  %3107 = vmatprep.subr.bf16.mxu0 %v3302_v0  ;;  %v1983_v57 = vld [vmem:[%s4408_s3 + $0x590] sm:$0xff]  ;;  %v3156_v59 = vpack.c.bf16 %v1964_v56, %v1963_v55 }
  0x86   :  { %3131 = vmatprep.subr.bf16.mxu1 %v3302_v0  ;;  %2664 = vmatprep.mubr.msk.f32.mxu0 %vm3303_vm0, %v3304_v8  ;;  %v3180_v60 = vpack.c.bf16 %v1984_v58, %v1983_v57  ;;  %v2005_v57 = vld [vmem:[%s4408_s3 + $0x620] sm:$0xff]  ;;  %v2006_v58 = vld [vmem:[%s4408_s3 + $0x628] sm:$0xff] }
  0x87   :  { %2699 = vmatprep.mubr.msk.f32.mxu1 %vm3303_vm0, %v3304_v8 }
  0x88   :  { %3109 = vmatpush3.bf16.msra.mxu0 %v3108_v62  ;;  %v1966_v62 = vld [vmem:[%s4408_s3 + $0x528] sm:$0xff] }
  0x89   :  { %3133 = vmatpush3.bf16.msra.mxu1 %v3132_v63  ;;  %3110 = vmatprep.subr.bf16.mxu0 %v3302_v0  ;;  %v1985_v63 = vld [vmem:[%s4408_s3 + $0x5a0] sm:$0xff]  ;;  %v3159_v2 = vpack.c.bf16 %v1966_v62, %v1965_v61  ;;  %v3207_v61 = vpack.c.bf16 %v2006_v58, %v2005_v57  ;;  %v2066_v57 = vld [vmem:[%s4408_s3 + $0x7a8] sm:$0xff] }
  0x8a   :  { %3134 = vmatprep.subr.bf16.mxu1 %v3302_v0  ;;  %v3183_v3 = vpack.c.bf16 %v1986_v1, %v1985_v63  ;;  %v2007_v63 = vld [vmem:[%s4408_s3 + $0x630] sm:$0xff]  ;;  %v2008_v1 = vld [vmem:[%s4408_s3 + $0x638] sm:$0xff] }
  0x8c   :  { %3112 = vmatpush3.bf16.msra.mxu0 %v3111_v5  ;;  %v1968_v5 = vld [vmem:[%s4408_s3 + $0x538] sm:$0xff] }
  0x8d   :  { %3136 = vmatpush3.bf16.msra.mxu1 %v3135_v6  ;;  %3113 = vmatprep.subr.bf16.mxu0 %v3302_v0  ;;  %v1987_v6 = vld [vmem:[%s4408_s3 + $0x5b0] sm:$0xff]  ;;  %v3162_v9 = vpack.c.bf16 %v1968_v5, %v1967_v4  ;;  %v3210_v4 = vpack.c.bf16 %v2008_v1, %v2007_v63 }
  0x8e   :  { %3137 = vmatprep.subr.bf16.mxu1 %v3302_v0  ;;  %v3186_v10 = vpack.c.bf16 %v1988_v7, %v1987_v6  ;;  %v2009_v6 = vld [vmem:[%s4408_s3 + $0x640] sm:$0xff]  ;;  %v2010_v7 = vld [vmem:[%s4408_s3 + $0x648] sm:$0xff] }
  0x90   :  { %3115 = vmatpush3.bf16.msra.mxu0 %v3114_v12  ;;  %v1970_v12 = vld [vmem:[%s4408_s3 + $0x548] sm:$0xff] }
  0x91   :  { %3139 = vmatpush3.bf16.msra.mxu1 %v3138_v13  ;;  %3116 = vmatprep.subr.bf16.mxu0 %v3302_v0  ;;  %v1989_v13 = vld [vmem:[%s4408_s3 + $0x5c0] sm:$0xff]  ;;  %v3165_v15 = vpack.c.bf16 %v1970_v12, %v1969_v11  ;;  %v3213_v11 = vpack.c.bf16 %v2010_v7, %v2009_v6 }
  0x92   :  { %3140 = vmatprep.subr.bf16.mxu1 %v3302_v0  ;;  %v3189_v16 = vpack.c.bf16 %v1990_v14, %v1989_v13  ;;  %v2011_v13 = vld [vmem:[%s4408_s3 + $0x650] sm:$0xff]  ;;  %v2012_v14 = vld [vmem:[%s4408_s3 + $0x658] sm:$0xff] }
  0x94   :  { %3118 = vmatpush3.bf16.msra.mxu0 %v3117_v18  ;;  %v1972_v18 = vld [vmem:[%s4408_s3 + $0x558] sm:$0xff] }
  0x95   :  { %3142 = vmatpush3.bf16.msra.mxu1 %v3141_v19  ;;  %3119 = vmatprep.subr.bf16.mxu0 %v3302_v0  ;;  %v1991_v19 = vld [vmem:[%s4408_s3 + $0x5d0] sm:$0xff]  ;;  %v3168_v21 = vpack.c.bf16 %v1972_v18, %v1971_v17  ;;  %v3216_v17 = vpack.c.bf16 %v2012_v14, %v2011_v13  ;;  %v1998_v18 = vld [vmem:[%s4410_s1 + $0xc] ss:$0 sm:$0xff]  ;;  %v2038_v14 = vld [vmem:[%s4410_s1 + $0xe] ss:$0 sm:$0xff] }
  0x96   :  { %3143 = vmatprep.subr.bf16.mxu1 %v3302_v0  ;;  %v3192_v23 = vpack.c.bf16 %v1992_v20, %v1991_v19  ;;  %v2013_v20 = vld [vmem:[%s4408_s3 + $0x660] sm:$0xff] }
  0x98   :  { %3121 = vmatpush3.bf16.msra.mxu0 %v3120_v24  ;;  %v1973_v24 = vld [vmem:[%s4408_s3 + $0x560] sm:$0xff] }
  0x99   :  { %3145 = vmatpush3.bf16.msra.mxu1 %v3144_v26  ;;  %3122 = vmatprep.subr.bf16.mxu0 %v3302_v0  ;;  %v1978_v26 = vld [vmem:[%s4410_s1 + $0xb] ss:$0 sm:$0xff]  ;;  %v3171_v30 = vpack.c.bf16 %v1974_v25, %v1973_v24  ;;  %v4240_v25 = vld [vmem:[%s4409_s0] sm:$0xff] }
  0x9a   :  { %3146 = vmatprep.subr.bf16.mxu1 %v3302_v0  ;;  %v1209_v32 = vmul.f32 %v1978_v26, %v3435_v37  ;;  %v1995_v37 = vld [vmem:[%s4408_s3 + $0x5f0] sm:$0xff]  ;;  %v2034_v24 = vld [vmem:[%s4408_s3 + $0x6e8] sm:$0xff]  ;;  %v1316_v26 = vmul.f32 %v4240_v25, %v1998_v18  ;;  %v1423_v29 = vmul.f32 %v4240_v25, %v2018_v22 }
  0x9b   :  { %v3198_v42 = vpack.c.bf16 %v1996_v38, %v1995_v37  ;;  %v2058_v18 = vld [vmem:[%s4410_s1 + $0xf] ss:$0 sm:$0xff] }
  0x9c   :  { %3124 = vmatpush3.bf16.msra.mxu0 %v3123_v33  ;;  %v3195_v33 = vpack.c.bf16 %v1994_v28, %v1993_v27  ;;  %v2000_v28 = vld [vmem:[%s4411_s2 + $0xc] ss:$0 sm:$0xff] }
  0x9d   :  { %3148 = vmatpush3.bf16.msra.mxu1 %v3147_v36  ;;  %3125 = vmatprep.subr.bf16.mxu0 %v3302_v0  ;;  %v1980_v36 = vld [vmem:[%s4411_s2 + $0xb] ss:$0 sm:$0xff] }
  0x9e   :  { %3149 = vmatprep.subr.bf16.mxu1 %v3302_v0  ;;  %v1218_v41 = vadd.f32 %v1980_v36, %v1209_v32  ;;  %v2016_v32 = vld [vmem:[%s4408_s3 + $0x678] sm:$0xff]  ;;  %v1325_v36 = vadd.f32 %v2000_v28, %v1316_v26 }
  0x9f   :  { %v3222_v37 = vpack.c.bf16 %v2016_v32, %v2015_v31  ;;  %v2055_v32 = vld [vmem:[%s4408_s3 + $0x770] sm:$0xff] }
  0xa0   :  { %3127 = vmatpush3.bf16.msra.mxu0 %v3126_v44  ;;  %v2002_v44 = vld [vmem:[%s4408_s3 + $0x608] sm:$0xff]  ;;  %v1219_v49 = vmax.f32 %v1218_v41, 0.0 }
  0xa1   :  { %3151 = vmatpush3.bf16.msra.mxu1 %v3150_v46  ;;  %3152 = vmatprep.subr.bf16.mxu0 %v3302_v0  ;;  %v2022_v46 = vld [vmem:[%s4408_s3 + $0x688] sm:$0xff]  ;;  %v3201_v48 = vpack.c.bf16 %v2002_v44, %v2001_v43  ;;  %v1326_v44 = vmax.f32 %v1325_v36, 0.0 }
  0xa2   :  { %3176 = vmatprep.subr.bf16.mxu1 %v3302_v0  ;;  %v3225_v50 = vpack.c.bf16 %v2022_v46, %v2021_v45  ;;  %v2042_v41 = vld [vmem:[%s4408_s3 + $0x708] sm:$0xff] }
  0xa3   :  { %2665 = vmatmul.mubr.f32.vlgmr.msra.gmra.mrb[8].mxu0 %v898_v51  ;;  %v2003_v51 = vld [vmem:[%s4408_s3 + $0x610] sm:$0xff]  ;;  %v2062_v43 = vld [vmem:[%s4408_s3 + $0x788] sm:$0xff] }
  0xa4   :  { %3154 = vmatpush3.bf16.msra.mxu0 %v3153_v52  ;;  %2700 = vmatmul.mubr.f32.vlgmr.msra.gmra.mrb[8].mxu1 %v1005_v53  ;;  %v2004_v52 = vld [vmem:[%s4408_s3 + $0x618] sm:$0xff]  ;;  %v2023_v53 = vld [vmem:[%s4408_s3 + $0x690] sm:$0xff] }
  0xa5   :  { %3178 = vmatpush3.bf16.msra.mxu1 %v3177_v54  ;;  %3155 = vmatprep.subr.bf16.mxu0 %v3302_v0  ;;  %v2024_v54 = vld [vmem:[%s4408_s3 + $0x698] sm:$0xff]  ;;  %v3204_v55 = vpack.c.bf16 %v2004_v52, %v2003_v51 }
  0xa6   :  { %3179 = vmatprep.subr.bf16.mxu1 %v3302_v0  ;;  %2734 = vmatprep.mubr.msk.f32.mxu0 %vm3303_vm0, %v3304_v8  ;;  %v3228_v56 = vpack.c.bf16 %v2024_v54, %v2023_v53  ;;  %v2064_v51 = vld [vmem:[%s4408_s3 + $0x798] sm:$0xff]  ;;  %v2045_v54 = vld [vmem:[%s4408_s3 + $0x720] sm:$0xff] }
  0xa7   :  { %2769 = vmatprep.mubr.msk.f32.mxu1 %vm3303_vm0, %v3304_v8 }
  0xa8   :  { %3157 = vmatpush3.bf16.msra.mxu0 %v3156_v59  ;;  %v2025_v59 = vld [vmem:[%s4408_s3 + $0x6a0] sm:$0xff] }
  0xa9   :  { %3181 = vmatpush3.bf16.msra.mxu1 %v3180_v60  ;;  %3158 = vmatprep.subr.bf16.mxu0 %v3302_v0  ;;  %v2026_v60 = vld [vmem:[%s4408_s3 + $0x6a8] sm:$0xff] }
  0xaa   :  { %3182 = vmatprep.subr.bf16.mxu1 %v3302_v0  ;;  %v3231_v62 = vpack.c.bf16 %v2026_v60, %v2025_v59  ;;  %v2047_v60 = vld [vmem:[%s4408_s3 + $0x730] sm:$0xff] }
  0xac   :  { %3160 = vmatpush3.bf16.msra.mxu0 %v3159_v2  ;;  %v2027_v2 = vld [vmem:[%s4408_s3 + $0x6b0] sm:$0xff] }
  0xad   :  { %3184 = vmatpush3.bf16.msra.mxu1 %v3183_v3  ;;  %3161 = vmatprep.subr.bf16.mxu0 %v3302_v0  ;;  %v2028_v3 = vld [vmem:[%s4408_s3 + $0x6b8] sm:$0xff] }
  0xae   :  { %3185 = vmatprep.subr.bf16.mxu1 %v3302_v0  ;;  %v3234_v5 = vpack.c.bf16 %v2028_v3, %v2027_v2  ;;  %v2049_v2 = vld [vmem:[%s4408_s3 + $0x740] sm:$0xff]  ;;  %v2050_v3 = vld [vmem:[%s4408_s3 + $0x748] sm:$0xff] }
  0xaf   :  { %v3261_v6 = vpack.c.bf16 %v2050_v3, %v2049_v2 }
  0xb0   :  { %3163 = vmatpush3.bf16.msra.mxu0 %v3162_v9  ;;  %v2029_v9 = vld [vmem:[%s4408_s3 + $0x6c0] sm:$0xff] }
  0xb1   :  { %3187 = vmatpush3.bf16.msra.mxu1 %v3186_v10  ;;  %3164 = vmatprep.subr.bf16.mxu0 %v3302_v0  ;;  %v2030_v10 = vld [vmem:[%s4408_s3 + $0x6c8] sm:$0xff] }
  0xb2   :  { %3188 = vmatprep.subr.bf16.mxu1 %v3302_v0  ;;  %v3237_v12 = vpack.c.bf16 %v2030_v10, %v2029_v9  ;;  %v2051_v9 = vld [vmem:[%s4408_s3 + $0x750] sm:$0xff]  ;;  %v2052_v10 = vld [vmem:[%s4408_s3 + $0x758] sm:$0xff] }
  0xb3   :  { %v3264_v13 = vpack.c.bf16 %v2052_v10, %v2051_v9 }
  0xb4   :  { %3166 = vmatpush3.bf16.msra.mxu0 %v3165_v15  ;;  %v2031_v15 = vld [vmem:[%s4408_s3 + $0x6d0] sm:$0xff] }
  0xb5   :  { %3190 = vmatpush3.bf16.msra.mxu1 %v3189_v16  ;;  %3167 = vmatprep.subr.bf16.mxu0 %v3302_v0  ;;  %v2032_v16 = vld [vmem:[%s4408_s3 + $0x6d8] sm:$0xff] }
  0xb6   :  { %3191 = vmatprep.subr.bf16.mxu1 %v3302_v0  ;;  %v3240_v19 = vpack.c.bf16 %v2032_v16, %v2031_v15  ;;  %v2053_v16 = vld [vmem:[%s4408_s3 + $0x760] sm:$0xff] }
  0xb8   :  { %3169 = vmatpush3.bf16.msra.mxu0 %v3168_v21  ;;  %v2014_v21 = vld [vmem:[%s4408_s3 + $0x668] sm:$0xff] }
  0xb9   :  { %3193 = vmatpush3.bf16.msra.mxu1 %v3192_v23  ;;  %3170 = vmatprep.subr.bf16.mxu0 %v3302_v0  ;;  %v2033_v23 = vld [vmem:[%s4408_s3 + $0x6e0] sm:$0xff]  ;;  %v3219_v27 = vpack.c.bf16 %v2014_v21, %v2013_v20  ;;  %v2074_v21 = vld [vmem:[%s4408_s3 + $0x7e8] sm:$0xff] }
  0xba   :  { %3194 = vmatprep.subr.bf16.mxu1 %v3302_v0  ;;  %v2073_v20 = vld [vmem:[%s4408_s3 + $0x7e0] sm:$0xff] }
  0xbb   :  { %v3291_v31 = vpack.c.bf16 %v2074_v21, %v2073_v20 }
  0xbc   :  { %3172 = vmatpush3.bf16.msra.mxu0 %v3171_v30  ;;  %v3243_v30 = vpack.c.bf16 %v2034_v24, %v2033_v23  ;;  %v1530_v24 = vmul.f32 %v4240_v25, %v2038_v14 }
  0xbd   :  { %3196 = vmatpush3.bf16.msra.mxu1 %v3195_v33  ;;  %3173 = vmatprep.subr.bf16.mxu0 %v3302_v0  ;;  %v2020_v33 = vld [vmem:[%s4411_s2 + $0xd] ss:$0 sm:$0xff] }
  0xbe   :  { %3197 = vmatprep.subr.bf16.mxu1 %v3302_v0  ;;  %v1432_v38 = vadd.f32 %v2020_v33, %v1423_v29  ;;  %v2040_v29 = vld [vmem:[%s4411_s2 + $0xe] ss:$0 sm:$0xff]  ;;  %v2056_v33 = vld [vmem:[%s4408_s3 + $0x778] sm:$0xff] }
  0xbf   :  { %v1539_v36 = vadd.f32 %v2040_v29, %v1530_v24 }
  0xc0   :  { %3175 = vmatpush3.bf16.msra.mxu0 %v3174_v40  ;;  %v2041_v40 = vld [vmem:[%s4408_s3 + $0x700] sm:$0xff]  ;;  %v1433_v46 = vmax.f32 %v1432_v38, 0.0 }
  0xc1   :  { %3199 = vmatpush3.bf16.msra.mxu1 %v3198_v42  ;;  %3200 = vmatprep.subr.bf16.mxu0 %v3302_v0  ;;  %v2061_v42 = vld [vmem:[%s4408_s3 + $0x780] sm:$0xff]  ;;  %v3249_v45 = vpack.c.bf16 %v2042_v41, %v2041_v40  ;;  %v1540_v40 = vmax.f32 %v1539_v36, 0.0 }
  0xc2   :  { %3224 = vmatprep.subr.bf16.mxu1 %v3302_v0 }
  0xc3   :  { %2735 = vmatmul.mubr.f32.vlgmr.msra.gmra.mrb[10].mxu0 %v1112_v47  ;;  %v3273_v47 = vpack.c.bf16 %v2062_v43, %v2061_v42 }
  0xc4   :  { %3202 = vmatpush3.bf16.msra.mxu0 %v3201_v48  ;;  %2770 = vmatmul.mubr.f32.vlgmr.msra.gmra.mrb[10].mxu1 %v1219_v49  ;;  %v2043_v48 = vld [vmem:[%s4408_s3 + $0x710] sm:$0xff]  ;;  %v2044_v49 = vld [vmem:[%s4408_s3 + $0x718] sm:$0xff] }
  0xc5   :  { %3226 = vmatpush3.bf16.msra.mxu1 %v3225_v50  ;;  %3203 = vmatprep.subr.bf16.mxu0 %v3302_v0  ;;  %v2063_v50 = vld [vmem:[%s4408_s3 + $0x790] sm:$0xff]  ;;  %v3252_v52 = vpack.c.bf16 %v2044_v49, %v2043_v48 }
  0xc6   :  { %3227 = vmatprep.subr.bf16.mxu1 %v3302_v0  ;;  %2804 = vmatprep.mubr.msk.f32.mxu0 %vm3303_vm0, %v3304_v8  ;;  %v3276_v53 = vpack.c.bf16 %v2064_v51, %v2063_v50 }
  0xc7   :  { %2839 = vmatprep.mubr.msk.f32.mxu1 %vm3303_vm0, %v3304_v8 }
  0xc8   :  { %3205 = vmatpush3.bf16.msra.mxu0 %v3204_v55  ;;  %v2046_v55 = vld [vmem:[%s4408_s3 + $0x728] sm:$0xff] }
  0xc9   :  { %3229 = vmatpush3.bf16.msra.mxu1 %v3228_v56  ;;  %3206 = vmatprep.subr.bf16.mxu0 %v3302_v0  ;;  %v2065_v56 = vld [vmem:[%s4408_s3 + $0x7a0] sm:$0xff]  ;;  %v3255_v58 = vpack.c.bf16 %v2046_v55, %v2045_v54 }
  0xca   :  { %3230 = vmatprep.subr.bf16.mxu1 %v3302_v0  ;;  %v3279_v59 = vpack.c.bf16 %v2066_v57, %v2065_v56 }
  0xcc   :  { %3208 = vmatpush3.bf16.msra.mxu0 %v3207_v61  ;;  %v2048_v61 = vld [vmem:[%s4408_s3 + $0x738] sm:$0xff] }
  0xcd   :  { %3232 = vmatpush3.bf16.msra.mxu1 %v3231_v62  ;;  %3209 = vmatprep.subr.bf16.mxu0 %v3302_v0  ;;  %v2068_v62 = vld [vmem:[%s4408_s3 + $0x7b8] sm:$0xff]  ;;  %v3258_v63 = vpack.c.bf16 %v2048_v61, %v2047_v60 }
  0xce   :  { %3233 = vmatprep.subr.bf16.mxu1 %v3302_v0 }
  0xd0   :  { %3211 = vmatpush3.bf16.msra.mxu0 %v3210_v4  ;;  %v2069_v4 = vld [vmem:[%s4408_s3 + $0x7c0] sm:$0xff] }
  0xd1   :  { %3235 = vmatpush3.bf16.msra.mxu1 %v3234_v5  ;;  %3212 = vmatprep.subr.bf16.mxu0 %v3302_v0  ;;  %v2070_v5 = vld [vmem:[%s4408_s3 + $0x7c8] sm:$0xff] }
  0xd2   :  { %3236 = vmatprep.subr.bf16.mxu1 %v3302_v0  ;;  %v3285_v7 = vpack.c.bf16 %v2070_v5, %v2069_v4 }
  0xd4   :  { %3214 = vmatpush3.bf16.msra.mxu0 %v3213_v11  ;;  %v2071_v11 = vld [vmem:[%s4408_s3 + $0x7d0] sm:$0xff] }
  0xd5   :  { %3238 = vmatpush3.bf16.msra.mxu1 %v3237_v12  ;;  %3215 = vmatprep.subr.bf16.mxu0 %v3302_v0  ;;  %v2072_v12 = vld [vmem:[%s4408_s3 + $0x7d8] sm:$0xff] }
  0xd6   :  { %3239 = vmatprep.subr.bf16.mxu1 %v3302_v0  ;;  %v3288_v15 = vpack.c.bf16 %v2072_v12, %v2071_v11 }
  0xd8   :  { %3217 = vmatpush3.bf16.msra.mxu0 %v3216_v17  ;;  %v2054_v17 = vld [vmem:[%s4408_s3 + $0x768] sm:$0xff] }
  0xd9   :  { %3241 = vmatpush3.bf16.msra.mxu1 %v3240_v19  ;;  %3218 = vmatprep.subr.bf16.mxu0 %v3302_v0  ;;  %v3267_v28 = vpack.c.bf16 %v2054_v17, %v2053_v16 }
  0xda   :  { %3242 = vmatprep.subr.bf16.mxu1 %v3302_v0 }
  0xdc   :  { %3220 = vmatpush3.bf16.msra.mxu0 %v3219_v27 }
  0xdd   :  { %3244 = vmatpush3.bf16.msra.mxu1 %v3243_v30  ;;  %3221 = vmatprep.subr.bf16.mxu0 %v3302_v0  ;;  %v1637_v30 = vmul.f32 %v4240_v25, %v2058_v18  ;;  %v2075_v25 = vld [vmem:[%s4408_s3 + $0x7f0] sm:$0xff] }
  0xde   :  { %3245 = vmatprep.subr.bf16.mxu1 %v3302_v0 }
  0xdf   :  { %v1646_v38 = vadd.f32 %v2060_v34, %v1637_v30 }
  0xe0   :  { %3223 = vmatpush3.bf16.msra.mxu0 %v3222_v37  ;;  %v3270_v37 = vpack.c.bf16 %v2056_v33, %v2055_v32 }
  0xe1   :  { %3247 = vmatpush3.bf16.msra.mxu1 %v3246_v39  ;;  %3248 = vmatprep.subr.bf16.mxu0 %v3302_v0  ;;  %v3294_v39 = vpack.c.bf16 %v2076_v35, %v2075_v25  ;;  %v1647_v41 = vmax.f32 %v1646_v38, 0.0 }
  0xe2   :  { %3272 = vmatprep.subr.bf16.mxu1 %v3302_v0 }
  0xe3   :  { %2805 = vmatmul.mubr.f32.vlgmr.msra.gmra.mrb[12].mxu0 %v1326_v44 }
  0xe4   :  { %3250 = vmatpush3.bf16.msra.mxu0 %v3249_v45  ;;  %2840 = vmatmul.mubr.f32.vlgmr.msra.gmra.mrb[12].mxu1 %v1433_v46 }
  0xe5   :  { %3274 = vmatpush3.bf16.msra.mxu1 %v3273_v47  ;;  %3251 = vmatprep.subr.bf16.mxu0 %v3302_v0 }
  0xe6   :  { %3275 = vmatprep.subr.bf16.mxu1 %v3302_v0  ;;  %2874 = vmatprep.mubr.msk.f32.mxu0 %vm3303_vm0, %v3304_v8 }
  0xe7   :  { %2909 = vmatprep.mubr.msk.f32.mxu1 %vm3303_vm0, %v3304_v8  ;;  %v2067_v8 = vld [vmem:[%s4408_s3 + $0x7b0] sm:$0xff] }
  0xe8   :  { %3253 = vmatpush3.bf16.msra.mxu0 %v3252_v52  ;;  %v3282_v1 = vpack.c.bf16 %v2068_v62, %v2067_v8 }
  0xe9   :  { %3277 = vmatpush3.bf16.msra.mxu1 %v3276_v53  ;;  %3254 = vmatprep.subr.bf16.mxu0 %v3302_v0 }
  0xea   :  { %3278 = vmatprep.subr.bf16.mxu1 %v3302_v0 }
  0xec   :  { %3256 = vmatpush3.bf16.msra.mxu0 %v3255_v58 }
  0xed   :  { %3280 = vmatpush3.bf16.msra.mxu1 %v3279_v59  ;;  %3257 = vmatprep.subr.bf16.mxu0 %v3302_v0  ;;  %v12_v59 = vstv %s4412_s6 }
  0xee   :  { %3281 = vmatprep.subr.bf16.mxu1 %v3302_v0  ;;  %13 = vst [vmem:[#allocation2] sm:$0x1] %v12_v59 }
  0xf0   :  { %3259 = vmatpush3.bf16.msra.mxu0 %v3258_v63 }
  0xf1   :  { %3283 = vmatpush3.bf16.msra.mxu1 %v3282_v1  ;;  %3260 = vmatprep.subr.bf16.mxu0 %v3302_v0 }
  0xf2   :  { %3284 = vmatprep.subr.bf16.mxu1 %v3302_v0 }
  0xf4   :  { %3262 = vmatpush3.bf16.msra.mxu0 %v3261_v6 }
  0xf5   :  { %3286 = vmatpush3.bf16.msra.mxu1 %v3285_v7  ;;  %3263 = vmatprep.subr.bf16.mxu0 %v3302_v0  ;;  %v2079_v29 = vld [vmem:[#allocation2] ss:$0 sm:$0xff] }
  0xf6   :  { %v164_v19 = vpop.f32.mrb[0].mxu0  ;;  %3287 = vmatprep.subr.bf16.mxu1 %v3302_v0 }
  0xf7   :  { %v2386_v22 = vpop.f32.mrb[1].mxu0  ;;  %v234_v23 = vpop.f32.mrb[0].mxu1 }
  0xf8   :  { %v235_v26 = vadd.f32 %v234_v23, %v164_v19  ;;  %3265 = vmatpush3.bf16.msra.mxu0 %v3264_v13  ;;  %v2421_v27 = vpop.f32.mrb[1].mxu1  ;;  %v2077_v19 = vld [vmem:[%s4413_s4] ss:$0 sm:$0xff] }
  0xf9   :  { %3289 = vmatpush3.bf16.msra.mxu1 %v3288_v15  ;;  %3266 = vmatprep.subr.bf16.mxu0 %v3302_v0  ;;  %v2078_v23 = vld [vmem:[%s4414_s5] ss:$0 sm:$0xff] }
  0xfa   :  { %3290 = vmatprep.subr.bf16.mxu1 %v3302_v0 }
  0xfc   :  { %3268 = vmatpush3.bf16.msra.mxu0 %v3267_v28  ;;  %v3305_v28 = vmov 0  }
  0xfd   :  { %3292 = vmatpush3.bf16.msra.mxu1 %v3291_v31  ;;  %3269 = vmatprep.subr.bf16.mxu0 %v3302_v0 }
  0xfe   :  { %3293 = vmatprep.subr.bf16.mxu1 %v3302_v0  ;;  %3300 = vset.pattern.permute.xlu0 %v3305_v28 }
 0x100   :  { %3271 = vmatpush3.bf16.msra.mxu0 %v3270_v37 }
 0x101   :  { %3295 = vmatpush3.bf16.msra.mxu1 %v3294_v39 }
 0x103   :  { %2875 = vmatmul.mubr.f32.vlgmr.msra.gmra.mrb[14].mxu0 %v1540_v40 }
 0x104   :  { %2910 = vmatmul.mubr.f32.vlgmr.msra.gmra.mrb[14].mxu1 %v1647_v41 }
 0x116   :  { %v340_v42 = vpop.f32.mrb[2].mxu0 }
 0x117   :  { %v344_v43 = vadd.f32 %v340_v42, %v235_v26  ;;  %v2456_v44 = vpop.f32.mrb[3].mxu0  ;;  %v447_v45 = vpop.f32.mrb[2].mxu1 }
 0x118   :  { %v2491_v46 = vpop.f32.mrb[3].mxu1 }
 0x119   :  { %v451_v47 = vadd.f32 %v447_v45, %v344_v43 }
 0x136   :  { %v554_v48 = vpop.f32.mrb[4].mxu0 }
 0x137   :  { %v558_v49 = vadd.f32 %v554_v48, %v451_v47  ;;  %v2526_v50 = vpop.f32.mrb[5].mxu0  ;;  %v661_v51 = vpop.f32.mrb[4].mxu1 }
 0x138   :  { %v2561_v52 = vpop.f32.mrb[5].mxu1 }
 0x139   :  { %v665_v53 = vadd.f32 %v661_v51, %v558_v49 }
 0x156   :  { %v768_v54 = vpop.f32.mrb[6].mxu0 }
 0x157   :  { %v772_v0 = vadd.f32 %v768_v54, %v665_v53  ;;  %v2596_v55 = vpop.f32.mrb[7].mxu0  ;;  %v875_v56 = vpop.f32.mrb[6].mxu1 }
 0x158   :  { %v2631_v57 = vpop.f32.mrb[7].mxu1 }
 0x159   :  { %v879_v58 = vadd.f32 %v875_v56, %v772_v0 }
 0x176   :  { %v982_v60 = vpop.f32.mrb[8].mxu0 }
 0x177   :  { %v986_v61 = vadd.f32 %v982_v60, %v879_v58  ;;  %v2666_v8 = vpop.f32.mrb[9].mxu0  ;;  %v1089_v62 = vpop.f32.mrb[8].mxu1 }
 0x178   :  { %v2701_v63 = vpop.f32.mrb[9].mxu1 }
 0x179   :  { %v1093_v1 = vadd.f32 %v1089_v62, %v986_v61 }
 0x196   :  { %v1196_v2 = vpop.f32.mrb[10].mxu0 }
 0x197   :  { %v1200_v3 = vadd.f32 %v1196_v2, %v1093_v1  ;;  %v2736_v4 = vpop.f32.mrb[11].mxu0  ;;  %v1303_v5 = vpop.f32.mrb[10].mxu1 }
 0x198   :  { %v2771_v6 = vpop.f32.mrb[11].mxu1 }
 0x199   :  { %v1307_v7 = vadd.f32 %v1303_v5, %v1200_v3 }
 0x1b6   :  { %v1410_v9 = vpop.f32.mrb[12].mxu0 }
 0x1b7   :  { %v1414_v10 = vadd.f32 %v1410_v9, %v1307_v7  ;;  %v2806_v11 = vpop.f32.mrb[13].mxu0  ;;  %v1517_v12 = vpop.f32.mrb[12].mxu1 }
 0x1b8   :  { %v2841_v13 = vpop.f32.mrb[13].mxu1 }
 0x1b9   :  { %v1521_v14 = vadd.f32 %v1517_v12, %v1414_v10 }
 0x1d6   :  { %v1624_v15 = vpop.f32.mrb[14].mxu0 }
 0x1d7   :  { %v1628_v16 = vadd.f32 %v1624_v15, %v1521_v14  ;;  %v2876_v17 = vpop.f32.mrb[15].mxu0  ;;  %v1731_v18 = vpop.f32.mrb[14].mxu1 }
 0x1d8   :  { %v2911_v20 = vpop.f32.mrb[15].mxu1 }
 0x1d9   :  { %v1735_v21 = vadd.f32 %v1731_v18, %v1628_v16 }
 0x1db   :  { %v1743_v22 = vadd.f32 %v2077_v19, %v1735_v21 }
 0x1dd   :  { %v1744_v24 = vmax.f32 %v1743_v22, 0.0 }
 0x1df   :  { %v1752_v26 = vmul.f32 %v2078_v23, %v1744_v24 }
 0x1e1   :  { %v1754_v27 = vsel %vm1753_vm1, %v1752_v26, 0.0 }
 0x1e2   :  { %1755 = vadd.xlane.f32.xlu0 %v1754_v27 }
 0x26f   :  { %v1756_v30 = vpop.xlane.xlu0 %1755 }
 0x270   :  { %v1764_v31 = vadd.f32 %v2079_v29, %v1756_v30 }
 0x272   :  { %1767 = vperm.xlu0 %3300, %v1764_v31  }
 0x2f1   :  { %v1768_v32 = vpop.permute.xlu0 %1767 }
 0x2f2   :  { %1770 = vst [vmem:[%s4415_s7] sm:$0xff] %v1768_v32 }

</bundles_post_ra>
